<compile_context>
chip_gen: v6e
topology: v6e:2x2x1
jax: 0.10.0
libtpu: 0.0.40
codegen_flags: <defaults>
</compile_context>

<pallas_src>
import functools

import jax
import jax.numpy as jnp
from jax.experimental import pallas as pl
from jax.experimental.pallas import tpu as pltpu

_LANE = 128
_SUBLANE = 8


def _ceil_to(x, m):
    return ((x + m - 1) // m) * m


def _lstm_chunk_kernel(gx_ref, h0_ref, c0_ref, lens_ref, whh_ref,
                       out_ref, ht_ref, ct_ref, h_sc, c_sc,
                       *, hidden_pad, time_chunk):
    c_idx = pl.program_id(1)          # time-chunk index (sequential axis)
    n_chunks = pl.num_programs(1)

    @pl.when(c_idx == 0)
    def _init():
        h_sc[...] = h0_ref[0].astype(jnp.float32)
        c_sc[...] = c0_ref[0].astype(jnp.float32)

    Hp = hidden_pad
    lens = lens_ref[...]              # [TB, Hp] int32 (length broadcast over lanes)
    t_base = c_idx * time_chunk

    def step(i, carry):
        h, c = carry
        # gates_x already contains x_t @ W_ih + bias (hoisted big matmul).
        gx = gx_ref[i].astype(jnp.float32)                       # [TB, 4*Hp]
        gates = gx + jnp.dot(h.astype(whh_ref.dtype), whh_ref[...],
                             preferred_element_type=jnp.float32)  # [TB, 4*Hp]
        # Gate slices are 128-lane aligned (columns padded per-gate to Hp).
        i_g = jax.nn.sigmoid(gates[:, 0 * Hp:1 * Hp])
        f_g = jax.nn.sigmoid(gates[:, 1 * Hp:2 * Hp])
        g_g = jnp.tanh(gates[:, 2 * Hp:3 * Hp])
        o_g = jax.nn.sigmoid(gates[:, 3 * Hp:4 * Hp])

        c_new = f_g * c + i_g * g_g
        h_new = o_g * jnp.tanh(c_new)

        # Packed-sequence mask: valid while global_t < length[b].  Boolean select
        # keeps padded garbage (even NaN/Inf) inert.
        valid = lens > (t_base + i)                              # bool [TB, Hp]
        h_u = jnp.where(valid, h_new, h)
        c_u = jnp.where(valid, c_new, c)

        out_ref[i] = jnp.where(valid, h_new, 0.0).astype(out_ref.dtype)
        return (h_u, c_u)

    h, c = jax.lax.fori_loop(0, time_chunk, step, (h_sc[...], c_sc[...]),
                             unroll=True)
    h_sc[...] = h
    c_sc[...] = c

    # ht/ct are resident accumulators; only the final chunk's state matters.
    @pl.when(c_idx == n_chunks - 1)
    def _final():
        ht_ref[0] = h.astype(ht_ref.dtype)
        ct_ref[0] = c.astype(ct_ref.dtype)


def rnn_encoder_forward(x_btd, lengths, h0, c0, w_ih, w_hh, bias,
                        *, time_chunk=8, matmul_dtype=jnp.float32):
    """LSTM encoder forward (batch_first, packed-sequence semantics via lengths).

    Args:
      x_btd:   [B, T, D]  batch-first padded input.
      lengths: [B]        int32 valid lengths per sequence.
      h0, c0:  [1, B, H]  initial state.
      w_ih:    [D, 4H], w_hh: [H, 4H], bias: [1, 4H]  (gate order i, f, g, o).

    Returns:
      output: [B, T, H] padded outputs (zeros past each length).
      (ht, ct): each [1, B, H].
    """
    B, T, D = x_btd.shape
    H = h0.shape[-1]

    H_pad = _ceil_to(H, _LANE)                 # lane-aligned hidden size
    G4 = 4 * H_pad
    TB = _SUBLANE                              # batch tile (sublane-aligned)
    B_pad = _ceil_to(max(B, TB), TB)
    n_btiles = B_pad // TB
    TC = max(1, min(time_chunk, T))            # timesteps per grid step
    T_pad = _ceil_to(T, TC)
    n_chunks = T_pad // TC

    def pad_gate_cols(w):
        # [..., 4H] -> [..., 4*H_pad], gate k placed at columns [k*H_pad, k*H_pad+H)
        parts = []
        for k in range(4):
            blk = w[..., k * H:(k + 1) * H]
            pads = [(0, 0)] * (w.ndim - 1) + [(0, H_pad - H)]
            parts.append(jnp.pad(blk, pads))
        return jnp.concatenate(parts, axis=-1)

    w_ih_p = pad_gate_cols(w_ih.astype(jnp.float32))                       # [D, 4Hp]
    w_hh_p = jnp.pad(pad_gate_cols(w_hh.astype(jnp.float32)),
                     ((0, H_pad - H), (0, 0))).astype(matmul_dtype)        # [Hp, 4Hp]
    bias_p = pad_gate_cols(bias.astype(jnp.float32))                       # [1, 4Hp]

    # Time-major, padded input; then the hoisted input projection as one big matmul.
    x_tbd = jnp.transpose(x_btd.astype(jnp.float32), (1, 0, 2))            # [T, B, D]
    x_tbd = jnp.pad(x_tbd, ((0, T_pad - T), (0, B_pad - B), (0, 0)))
    gates_x = jnp.dot(x_tbd.reshape(T_pad * B_pad, D).astype(matmul_dtype),
                      w_ih_p.astype(matmul_dtype),
                      preferred_element_type=jnp.float32) + bias_p
    gates_x = gates_x.reshape(T_pad, B_pad, G4)                            # [Tp, Bp, 4Hp]

    h0_p = jnp.pad(h0.astype(jnp.float32), ((0, 0), (0, B_pad - B), (0, H_pad - H)))
    c0_p = jnp.pad(c0.astype(jnp.float32), ((0, 0), (0, B_pad - B), (0, H_pad - H)))

    lens_p = jnp.pad(lengths.astype(jnp.int32), (0, B_pad - B))            # pads -> 0
    lens_bh = jnp.broadcast_to(lens_p[:, None], (B_pad, H_pad))            # [Bp, Hp]

    out_dtype = x_btd.dtype
    kernel = functools.partial(_lstm_chunk_kernel, hidden_pad=H_pad, time_chunk=TC)

    # Generous VMEM budget (double-buffered gates_x/out chunks + resident W_hh).
    bytes_needed = (
        2 * H_pad * G4 * jnp.dtype(matmul_dtype).itemsize
        + 2 * TC * TB * G4 * 4
        + 2 * TC * TB * H_pad * jnp.dtype(out_dtype).itemsize
        + 8 * TB * H_pad * 4
    )
    vmem_limit = int(min(max(16 * 1024 * 1024, 2 * bytes_needed), 64 * 1024 * 1024))

    out_tbh, ht_p, ct_p = pl.pallas_call(
        kernel,
        out_shape=(
            jax.ShapeDtypeStruct((T_pad, B_pad, H_pad), out_dtype),
            jax.ShapeDtypeStruct((1, B_pad, H_pad), out_dtype),
            jax.ShapeDtypeStruct((1, B_pad, H_pad), out_dtype),
        ),
        grid_spec=pltpu.PrefetchScalarGridSpec(
            num_scalar_prefetch=0,
            grid=(n_btiles, n_chunks),
            in_specs=[
                pl.BlockSpec((TC, TB, G4), lambda bt, c: (c, bt, 0)),      # gates_x chunk
                pl.BlockSpec((1, TB, H_pad), lambda bt, c: (0, bt, 0)),    # h0
                pl.BlockSpec((1, TB, H_pad), lambda bt, c: (0, bt, 0)),    # c0
                pl.BlockSpec((TB, H_pad), lambda bt, c: (bt, 0)),          # lengths bcast
                pl.BlockSpec((H_pad, G4), lambda bt, c: (0, 0)),           # W_hh (resident)
            ],
            out_specs=[
                pl.BlockSpec((TC, TB, H_pad), lambda bt, c: (c, bt, 0)),   # output slab
                pl.BlockSpec((1, TB, H_pad), lambda bt, c: (0, bt, 0)),    # ht (accumulator)
                pl.BlockSpec((1, TB, H_pad), lambda bt, c: (0, bt, 0)),    # ct (accumulator)
            ],
            scratch_shapes=[
                pltpu.VMEM((TB, H_pad), jnp.float32),                      # h state
                pltpu.VMEM((TB, H_pad), jnp.float32),                      # c state
            ],
        ),
        compiler_params=pltpu.CompilerParams(
            dimension_semantics=("parallel", "arbitrary"),
            vmem_limit_bytes=vmem_limit,
        ),
    )(gates_x, h0_p, c0_p, lens_bh, w_hh_p)

    output = jnp.transpose(out_tbh[:T, :B, :H], (1, 0, 2))   # back to [B, T, H]
    ht = ht_p[:, :B, :H]
    ct = ct_p[:, :B, :H]
    return output, (ht, ct)


def _reference_lstm(x_btd, lengths, h0, c0, w_ih, w_hh, bias):
    """Pure-JAX reference (lax.scan) for correctness checking."""
    B, T, D = x_btd.shape
    H = h0.shape[-1]
    x_tbd = jnp.transpose(x_btd, (1, 0, 2)).astype(jnp.float32)

    def step(carry, inp):
        h, c = carry
        x_t, t = inp
        gates = x_t @ w_ih + h @ w_hh + bias
        i_g = jax.nn.sigmoid(gates[:, 0 * H:1 * H])
        f_g = jax.nn.sigmoid(gates[:, 1 * H:2 * H])
        g_g = jnp.tanh(gates[:, 2 * H:3 * H])
        o_g = jax.nn.sigmoid(gates[:, 3 * H:4 * H])
        c_new = f_g * c + i_g * g_g
        h_new = o_g * jnp.tanh(c_new)
        mask = (lengths > t).astype(jnp.float32)[:, None]
        h_u = mask * h_new + (1 - mask) * h
        c_u = mask * c_new + (1 - mask) * c
        return (h_u, c_u), mask * h_new

    (h_f, c_f), out = jax.lax.scan(
        step, (h0[0].astype(jnp.float32), c0[0].astype(jnp.float32)),
        (x_tbd, jnp.arange(T)))
    return jnp.transpose(out, (1, 0, 2)), (h_f[None], c_f[None])


if __name__ == "__main__":
    B, T, D, H = 2, 8, 16, 32

    key = jax.random.PRNGKey(0)
    k_x, k_h, k_c, k_wih, k_whh, k_b = jax.random.split(key, 6)

    x = jax.random.normal(k_x, (B, T, D), dtype=jnp.float32)
    lengths = jnp.array([T, 5], dtype=jnp.int32)
    h0 = jax.random.normal(k_h, (1, B, H), dtype=jnp.float32) * 0.1
    c0 = jax.random.normal(k_c, (1, B, H), dtype=jnp.float32) * 0.1

    scale = 1.0 / jnp.sqrt(H).astype(jnp.float32)
    w_ih = jax.random.uniform(k_wih, (D, 4 * H), jnp.float32, -scale, scale)
    w_hh = jax.random.uniform(k_whh, (H, 4 * H), jnp.float32, -scale, scale)
    bias = jax.random.uniform(k_b, (1, 4 * H), jnp.float32, -scale, scale)

    fwd = jax.jit(rnn_encoder_forward, static_argnames=("time_chunk", "matmul_dtype"))
    output, (ht, ct) = fwd(x, lengths, h0, c0, w_ih, w_hh, bias)
    jax.block_until_ready((output, ht, ct))

    out_ref, (ht_ref, ct_ref) = _reference_lstm(x, lengths, h0, c0, w_ih, w_hh, bias)
    assert output.shape == (B, T, H)
    assert ht.shape == (1, B, H) and ct.shape == (1, B, H)
    assert jnp.allclose(output, out_ref, atol=1e-4), "output mismatch"
    assert jnp.allclose(ht, ht_ref, atol=1e-4), "ht mismatch"
    assert jnp.allclose(ct, ct_ref, atol=1e-4), "ct mismatch"

    print("KERNEL_OK")
</pallas_src>

<mosaic_0001>
module attributes {stable_mosaic.version = 11 : i64} {
  func.func @_lstm_chunk_kernel(%arg0: i32, %arg1: i32, %arg2: memref<8x8x512xf32, #tpu.memory_space<vmem>>, %arg3: memref<1x8x128xf32, #tpu.memory_space<vmem>>, %arg4: memref<1x8x128xf32, #tpu.memory_space<vmem>>, %arg5: memref<8x128xi32, #tpu.memory_space<vmem>>, %arg6: memref<128x512xf32, #tpu.memory_space<vmem>>, %arg7: memref<8x8x128xf32, #tpu.memory_space<vmem>>, %arg8: memref<1x8x128xf32, #tpu.memory_space<vmem>>, %arg9: memref<1x8x128xf32, #tpu.memory_space<vmem>>, %arg10: memref<8x128xf32, #tpu.memory_space<vmem>>, %arg11: memref<8x128xf32, #tpu.memory_space<vmem>>) attributes {dimension_semantics = [#tpu.dimension_semantics<parallel>, #tpu.dimension_semantics<arbitrary>], iteration_bounds = array<i64: 1, 1>, scalar_prefetch = 0 : i64, scratch_operands = 2 : i64, tpu.core_type = #tpu.core_type<tc>, window_params = [{transform_indices = @transform_0, window_bounds = array<i64: 8, 8, 512>}, {transform_indices = @transform_1, window_bounds = array<i64: 1, 8, 128>}, {transform_indices = @transform_2, window_bounds = array<i64: 1, 8, 128>}, {transform_indices = @transform_3, window_bounds = array<i64: 8, 128>}, {pipeline_mode = #tpu.pipeline_mode<synchronous>, transform_indices = @transform_4, window_bounds = array<i64: 128, 512>}, {transform_indices = @transform_5, window_bounds = array<i64: 8, 8, 128>}, {transform_indices = @transform_6, window_bounds = array<i64: 1, 8, 128>}, {transform_indices = @transform_7, window_bounds = array<i64: 1, 8, 128>}]} {
    %c0_i32 = arith.constant 0 : i32
    %0 = arith.cmpi eq, %arg1, %c0_i32 : i32
    %1 = arith.extui %0 : i1 to i32
    %c0_i32_0 = arith.constant 0 : i32
    %2 = arith.cmpi ne, %1, %c0_i32_0 : i32
    scf.if %2 {
      %c0_101 = arith.constant 0 : index
      %c0_102 = arith.constant 0 : index
      %c0_103 = arith.constant 0 : index
      %348 = vector.load %arg3[%c0_101, %c0_102, %c0_103] : memref<1x8x128xf32, #tpu.memory_space<vmem>>, vector<1x8x128xf32>
      %349 = vector.shape_cast %348 : vector<1x8x128xf32> to vector<8x128xf32>
      %c0_104 = arith.constant 0 : index
      %c0_105 = arith.constant 0 : index
      %350 = vector.load %arg10[%c0_104, %c0_105] : memref<8x128xf32, #tpu.memory_space<vmem>>, vector<8x128xf32>
      tpu.vector_store %arg10[%c0_104, %c0_105], %349 {strides = array<i32>} : memref<8x128xf32, #tpu.memory_space<vmem>>, vector<8x128xf32>,
      %c0_106 = arith.constant 0 : index
      %c0_107 = arith.constant 0 : index
      %c0_108 = arith.constant 0 : index
      %351 = vector.load %arg4[%c0_106, %c0_107, %c0_108] : memref<1x8x128xf32, #tpu.memory_space<vmem>>, vector<1x8x128xf32>
      %352 = vector.shape_cast %351 : vector<1x8x128xf32> to vector<8x128xf32>
      %c0_109 = arith.constant 0 : index
      %c0_110 = arith.constant 0 : index
      %353 = vector.load %arg11[%c0_109, %c0_110] : memref<8x128xf32, #tpu.memory_space<vmem>>, vector<8x128xf32>
      tpu.vector_store %arg11[%c0_109, %c0_110], %352 {strides = array<i32>} : memref<8x128xf32, #tpu.memory_space<vmem>>, vector<8x128xf32>,
    } else {
    }
    %c0 = arith.constant 0 : index
    %c0_1 = arith.constant 0 : index
    %3 = vector.load %arg5[%c0, %c0_1] : memref<8x128xi32, #tpu.memory_space<vmem>>, vector<8x128xi32>
    %c8_i32 = arith.constant 8 : i32
    %4 = arith.muli %arg1, %c8_i32 : i32
    %c0_2 = arith.constant 0 : index
    %c0_3 = arith.constant 0 : index
    %5 = vector.load %arg10[%c0_2, %c0_3] : memref<8x128xf32, #tpu.memory_space<vmem>>, vector<8x128xf32>
    %c0_4 = arith.constant 0 : index
    %c0_5 = arith.constant 0 : index
    %6 = vector.load %arg11[%c0_4, %c0_5] : memref<8x128xf32, #tpu.memory_space<vmem>>, vector<8x128xf32>
    %c0_i32_6 = arith.constant 0 : i32
    %7 = arith.index_cast %c0_i32_6 : i32 to index
    %c0_7 = arith.constant 0 : index
    %c0_8 = arith.constant 0 : index
    %8 = vector.load %arg2[%7, %c0_7, %c0_8] : memref<8x8x512xf32, #tpu.memory_space<vmem>>, vector<1x8x512xf32>
    %9 = vector.shape_cast %8 : vector<1x8x512xf32> to vector<8x512xf32>
    %c0_9 = arith.constant 0 : index
    %c0_10 = arith.constant 0 : index
    %10 = vector.load %arg6[%c0_9, %c0_10] : memref<128x512xf32, #tpu.memory_space<vmem>>, vector<128x512xf32>
    %cst = arith.constant dense<0.000000e+00> : vector<8x512xf32>
    %11 = tpu.matmul %5, %10, %cst {dimension_numbers = #tpu.dot_dimension_numbers<[1], [0], [0], [1], [0, 0, 1, 1], [], []>} : vector<8x128xf32>, vector<128x512xf32>, vector<8x512xf32> -> vector<8x512xf32>
    %12 = arith.addf %9, %11 : vector<8x512xf32>
    %13 = vector.extract_strided_slice %12 {offsets = [0, 0], sizes = [8, 128], strides = [1, 1]} : vector<8x512xf32> to vector<8x128xf32>
    %14 = arith.negf %13 : vector<8x128xf32>
    %15 = math.exp %14 : vector<8x128xf32>
    %cst_11 = arith.constant 1.000000e+00 : f32
    %16 = vector.broadcast %cst_11 : f32 to vector<8x128xf32>
    %17 = arith.addf %16, %15 : vector<8x128xf32>
    %18 = arith.divf %16, %17 : vector<8x128xf32>
    %19 = vector.extract_strided_slice %12 {offsets = [0, 128], sizes = [8, 128], strides = [1, 1]} : vector<8x512xf32> to vector<8x128xf32>
    %20 = arith.negf %19 : vector<8x128xf32>
    %21 = math.exp %20 : vector<8x128xf32>
    %cst_12 = arith.constant 1.000000e+00 : f32
    %22 = vector.broadcast %cst_12 : f32 to vector<8x128xf32>
    %23 = arith.addf %22, %21 : vector<8x128xf32>
    %24 = arith.divf %22, %23 : vector<8x128xf32>
    %25 = vector.extract_strided_slice %12 {offsets = [0, 256], sizes = [8, 128], strides = [1, 1]} : vector<8x512xf32> to vector<8x128xf32>
    %26 = math.tanh %25 : vector<8x128xf32>
    %27 = vector.extract_strided_slice %12 {offsets = [0, 384], sizes = [8, 128], strides = [1, 1]} : vector<8x512xf32> to vector<8x128xf32>
    %28 = arith.negf %27 : vector<8x128xf32>
    %29 = math.exp %28 : vector<8x128xf32>
    %cst_13 = arith.constant 1.000000e+00 : f32
    %30 = vector.broadcast %cst_13 : f32 to vector<8x128xf32>
    %31 = arith.addf %30, %29 : vector<8x128xf32>
    %32 = arith.divf %30, %31 : vector<8x128xf32>
    %33 = arith.mulf %24, %6 : vector<8x128xf32>
    %34 = arith.mulf %18, %26 : vector<8x128xf32>
    %35 = arith.addf %33, %34 : vector<8x128xf32>
    %36 = math.tanh %35 : vector<8x128xf32>
    %37 = arith.mulf %32, %36 : vector<8x128xf32>
    %38 = arith.addi %4, %c0_i32_6 : i32
    %39 = vector.broadcast %38 : i32 to vector<8x128xi32>
    %40 = arith.cmpi sgt, %3, %39 : vector<8x128xi32>
    %41 = arith.select %40, %37, %5 : vector<8x128xi1>, vector<8x128xf32>
    %42 = arith.select %40, %35, %6 : vector<8x128xi1>, vector<8x128xf32>
    %cst_14 = arith.constant 0.000000e+00 : f32
    %43 = vector.broadcast %cst_14 : f32 to vector<8x128xf32>
    %44 = arith.select %40, %37, %43 : vector<8x128xi1>, vector<8x128xf32>
    %45 = arith.index_cast %c0_i32_6 : i32 to index
    %c0_15 = arith.constant 0 : index
    %c0_16 = arith.constant 0 : index
    %46 = vector.load %arg7[%45, %c0_15, %c0_16] : memref<8x8x128xf32, #tpu.memory_space<vmem>>, vector<1x8x128xf32>
    %47 = vector.shape_cast %46 : vector<1x8x128xf32> to vector<8x128xf32>
    %48 = vector.shape_cast %44 : vector<8x128xf32> to vector<1x8x128xf32>
    tpu.vector_store %arg7[%45, %c0_15, %c0_16], %48 {strides = array<i32>} : memref<8x8x128xf32, #tpu.memory_space<vmem>>, vector<1x8x128xf32>,
    %c1_i32 = arith.constant 1 : i32
    %49 = arith.index_cast %c1_i32 : i32 to index
    %c0_17 = arith.constant 0 : index
    %c0_18 = arith.constant 0 : index
    %50 = vector.load %arg2[%49, %c0_17, %c0_18] : memref<8x8x512xf32, #tpu.memory_space<vmem>>, vector<1x8x512xf32>
    %51 = vector.shape_cast %50 : vector<1x8x512xf32> to vector<8x512xf32>
    %c0_19 = arith.constant 0 : index
    %c0_20 = arith.constant 0 : index
    %52 = vector.load %arg6[%c0_19, %c0_20] : memref<128x512xf32, #tpu.memory_space<vmem>>, vector<128x512xf32>
    %cst_21 = arith.constant dense<0.000000e+00> : vector<8x512xf32>
    %53 = tpu.matmul %41, %52, %cst_21 {dimension_numbers = #tpu.dot_dimension_numbers<[1], [0], [0], [1], [0, 0, 1, 1], [], []>} : vector<8x128xf32>, vector<128x512xf32>, vector<8x512xf32> -> vector<8x512xf32>
    %54 = arith.addf %51, %53 : vector<8x512xf32>
    %55 = vector.extract_strided_slice %54 {offsets = [0, 0], sizes = [8, 128], strides = [1, 1]} : vector<8x512xf32> to vector<8x128xf32>
    %56 = arith.negf %55 : vector<8x128xf32>
    %57 = math.exp %56 : vector<8x128xf32>
    %cst_22 = arith.constant 1.000000e+00 : f32
    %58 = vector.broadcast %cst_22 : f32 to vector<8x128xf32>
    %59 = arith.addf %58, %57 : vector<8x128xf32>
    %60 = arith.divf %58, %59 : vector<8x128xf32>
    %61 = vector.extract_strided_slice %54 {offsets = [0, 128], sizes = [8, 128], strides = [1, 1]} : vector<8x512xf32> to vector<8x128xf32>
    %62 = arith.negf %61 : vector<8x128xf32>
    %63 = math.exp %62 : vector<8x128xf32>
    %cst_23 = arith.constant 1.000000e+00 : f32
    %64 = vector.broadcast %cst_23 : f32 to vector<8x128xf32>
    %65 = arith.addf %64, %63 : vector<8x128xf32>
    %66 = arith.divf %64, %65 : vector<8x128xf32>
    %67 = vector.extract_strided_slice %54 {offsets = [0, 256], sizes = [8, 128], strides = [1, 1]} : vector<8x512xf32> to vector<8x128xf32>
    %68 = math.tanh %67 : vector<8x128xf32>
    %69 = vector.extract_strided_slice %54 {offsets = [0, 384], sizes = [8, 128], strides = [1, 1]} : vector<8x512xf32> to vector<8x128xf32>
    %70 = arith.negf %69 : vector<8x128xf32>
    %71 = math.exp %70 : vector<8x128xf32>
    %cst_24 = arith.constant 1.000000e+00 : f32
    %72 = vector.broadcast %cst_24 : f32 to vector<8x128xf32>
    %73 = arith.addf %72, %71 : vector<8x128xf32>
    %74 = arith.divf %72, %73 : vector<8x128xf32>
    %75 = arith.mulf %66, %42 : vector<8x128xf32>
    %76 = arith.mulf %60, %68 : vector<8x128xf32>
    %77 = arith.addf %75, %76 : vector<8x128xf32>
    %78 = math.tanh %77 : vector<8x128xf32>
    %79 = arith.mulf %74, %78 : vector<8x128xf32>
    %80 = arith.addi %4, %c1_i32 : i32
    %81 = vector.broadcast %80 : i32 to vector<8x128xi32>
    %82 = arith.cmpi sgt, %3, %81 : vector<8x128xi32>
    %83 = arith.select %82, %79, %41 : vector<8x128xi1>, vector<8x128xf32>
    %84 = arith.select %82, %77, %42 : vector<8x128xi1>, vector<8x128xf32>
    %cst_25 = arith.constant 0.000000e+00 : f32
    %85 = vector.broadcast %cst_25 : f32 to vector<8x128xf32>
    %86 = arith.select %82, %79, %85 : vector<8x128xi1>, vector<8x128xf32>
    %87 = arith.index_cast %c1_i32 : i32 to index
    %c0_26 = arith.constant 0 : index
    %c0_27 = arith.constant 0 : index
    %88 = vector.load %arg7[%87, %c0_26, %c0_27] : memref<8x8x128xf32, #tpu.memory_space<vmem>>, vector<1x8x128xf32>
    %89 = vector.shape_cast %88 : vector<1x8x128xf32> to vector<8x128xf32>
    %90 = vector.shape_cast %86 : vector<8x128xf32> to vector<1x8x128xf32>
    tpu.vector_store %arg7[%87, %c0_26, %c0_27], %90 {strides = array<i32>} : memref<8x8x128xf32, #tpu.memory_space<vmem>>, vector<1x8x128xf32>,
    %c2_i32 = arith.constant 2 : i32
    %91 = arith.index_cast %c2_i32 : i32 to index
    %c0_28 = arith.constant 0 : index
    %c0_29 = arith.constant 0 : index
    %92 = vector.load %arg2[%91, %c0_28, %c0_29] : memref<8x8x512xf32, #tpu.memory_space<vmem>>, vector<1x8x512xf32>
    %93 = vector.shape_cast %92 : vector<1x8x512xf32> to vector<8x512xf32>
    %c0_30 = arith.constant 0 : index
    %c0_31 = arith.constant 0 : index
    %94 = vector.load %arg6[%c0_30, %c0_31] : memref<128x512xf32, #tpu.memory_space<vmem>>, vector<128x512xf32>
    %cst_32 = arith.constant dense<0.000000e+00> : vector<8x512xf32>
    %95 = tpu.matmul %83, %94, %cst_32 {dimension_numbers = #tpu.dot_dimension_numbers<[1], [0], [0], [1], [0, 0, 1, 1], [], []>} : vector<8x128xf32>, vector<128x512xf32>, vector<8x512xf32> -> vector<8x512xf32>
    %96 = arith.addf %93, %95 : vector<8x512xf32>
    %97 = vector.extract_strided_slice %96 {offsets = [0, 0], sizes = [8, 128], strides = [1, 1]} : vector<8x512xf32> to vector<8x128xf32>
    %98 = arith.negf %97 : vector<8x128xf32>
    %99 = math.exp %98 : vector<8x128xf32>
    %cst_33 = arith.constant 1.000000e+00 : f32
    %100 = vector.broadcast %cst_33 : f32 to vector<8x128xf32>
    %101 = arith.addf %100, %99 : vector<8x128xf32>
    %102 = arith.divf %100, %101 : vector<8x128xf32>
    %103 = vector.extract_strided_slice %96 {offsets = [0, 128], sizes = [8, 128], strides = [1, 1]} : vector<8x512xf32> to vector<8x128xf32>
    %104 = arith.negf %103 : vector<8x128xf32>
    %105 = math.exp %104 : vector<8x128xf32>
    %cst_34 = arith.constant 1.000000e+00 : f32
    %106 = vector.broadcast %cst_34 : f32 to vector<8x128xf32>
    %107 = arith.addf %106, %105 : vector<8x128xf32>
    %108 = arith.divf %106, %107 : vector<8x128xf32>
    %109 = vector.extract_strided_slice %96 {offsets = [0, 256], sizes = [8, 128], strides = [1, 1]} : vector<8x512xf32> to vector<8x128xf32>
    %110 = math.tanh %109 : vector<8x128xf32>
    %111 = vector.extract_strided_slice %96 {offsets = [0, 384], sizes = [8, 128], strides = [1, 1]} : vector<8x512xf32> to vector<8x128xf32>
    %112 = arith.negf %111 : vector<8x128xf32>
    %113 = math.exp %112 : vector<8x128xf32>
    %cst_35 = arith.constant 1.000000e+00 : f32
    %114 = vector.broadcast %cst_35 : f32 to vector<8x128xf32>
    %115 = arith.addf %114, %113 : vector<8x128xf32>
    %116 = arith.divf %114, %115 : vector<8x128xf32>
    %117 = arith.mulf %108, %84 : vector<8x128xf32>
    %118 = arith.mulf %102, %110 : vector<8x128xf32>
    %119 = arith.addf %117, %118 : vector<8x128xf32>
    %120 = math.tanh %119 : vector<8x128xf32>
    %121 = arith.mulf %116, %120 : vector<8x128xf32>
    %122 = arith.addi %4, %c2_i32 : i32
    %123 = vector.broadcast %122 : i32 to vector<8x128xi32>
    %124 = arith.cmpi sgt, %3, %123 : vector<8x128xi32>
    %125 = arith.select %124, %121, %83 : vector<8x128xi1>, vector<8x128xf32>
    %126 = arith.select %124, %119, %84 : vector<8x128xi1>, vector<8x128xf32>
    %cst_36 = arith.constant 0.000000e+00 : f32
    %127 = vector.broadcast %cst_36 : f32 to vector<8x128xf32>
    %128 = arith.select %124, %121, %127 : vector<8x128xi1>, vector<8x128xf32>
    %129 = arith.index_cast %c2_i32 : i32 to index
    %c0_37 = arith.constant 0 : index
    %c0_38 = arith.constant 0 : index
    %130 = vector.load %arg7[%129, %c0_37, %c0_38] : memref<8x8x128xf32, #tpu.memory_space<vmem>>, vector<1x8x128xf32>
    %131 = vector.shape_cast %130 : vector<1x8x128xf32> to vector<8x128xf32>
    %132 = vector.shape_cast %128 : vector<8x128xf32> to vector<1x8x128xf32>
    tpu.vector_store %arg7[%129, %c0_37, %c0_38], %132 {strides = array<i32>} : memref<8x8x128xf32, #tpu.memory_space<vmem>>, vector<1x8x128xf32>,
    %c3_i32 = arith.constant 3 : i32
    %133 = arith.index_cast %c3_i32 : i32 to index
    %c0_39 = arith.constant 0 : index
    %c0_40 = arith.constant 0 : index
    %134 = vector.load %arg2[%133, %c0_39, %c0_40] : memref<8x8x512xf32, #tpu.memory_space<vmem>>, vector<1x8x512xf32>
    %135 = vector.shape_cast %134 : vector<1x8x512xf32> to vector<8x512xf32>
    %c0_41 = arith.constant 0 : index
    %c0_42 = arith.constant 0 : index
    %136 = vector.load %arg6[%c0_41, %c0_42] : memref<128x512xf32, #tpu.memory_space<vmem>>, vector<128x512xf32>
    %cst_43 = arith.constant dense<0.000000e+00> : vector<8x512xf32>
    %137 = tpu.matmul %125, %136, %cst_43 {dimension_numbers = #tpu.dot_dimension_numbers<[1], [0], [0], [1], [0, 0, 1, 1], [], []>} : vector<8x128xf32>, vector<128x512xf32>, vector<8x512xf32> -> vector<8x512xf32>
    %138 = arith.addf %135, %137 : vector<8x512xf32>
    %139 = vector.extract_strided_slice %138 {offsets = [0, 0], sizes = [8, 128], strides = [1, 1]} : vector<8x512xf32> to vector<8x128xf32>
    %140 = arith.negf %139 : vector<8x128xf32>
    %141 = math.exp %140 : vector<8x128xf32>
    %cst_44 = arith.constant 1.000000e+00 : f32
    %142 = vector.broadcast %cst_44 : f32 to vector<8x128xf32>
    %143 = arith.addf %142, %141 : vector<8x128xf32>
    %144 = arith.divf %142, %143 : vector<8x128xf32>
    %145 = vector.extract_strided_slice %138 {offsets = [0, 128], sizes = [8, 128], strides = [1, 1]} : vector<8x512xf32> to vector<8x128xf32>
    %146 = arith.negf %145 : vector<8x128xf32>
    %147 = math.exp %146 : vector<8x128xf32>
    %cst_45 = arith.constant 1.000000e+00 : f32
    %148 = vector.broadcast %cst_45 : f32 to vector<8x128xf32>
    %149 = arith.addf %148, %147 : vector<8x128xf32>
    %150 = arith.divf %148, %149 : vector<8x128xf32>
    %151 = vector.extract_strided_slice %138 {offsets = [0, 256], sizes = [8, 128], strides = [1, 1]} : vector<8x512xf32> to vector<8x128xf32>
    %152 = math.tanh %151 : vector<8x128xf32>
    %153 = vector.extract_strided_slice %138 {offsets = [0, 384], sizes = [8, 128], strides = [1, 1]} : vector<8x512xf32> to vector<8x128xf32>
    %154 = arith.negf %153 : vector<8x128xf32>
    %155 = math.exp %154 : vector<8x128xf32>
    %cst_46 = arith.constant 1.000000e+00 : f32
    %156 = vector.broadcast %cst_46 : f32 to vector<8x128xf32>
    %157 = arith.addf %156, %155 : vector<8x128xf32>
    %158 = arith.divf %156, %157 : vector<8x128xf32>
    %159 = arith.mulf %150, %126 : vector<8x128xf32>
    %160 = arith.mulf %144, %152 : vector<8x128xf32>
    %161 = arith.addf %159, %160 : vector<8x128xf32>
    %162 = math.tanh %161 : vector<8x128xf32>
    %163 = arith.mulf %158, %162 : vector<8x128xf32>
    %164 = arith.addi %4, %c3_i32 : i32
    %165 = vector.broadcast %164 : i32 to vector<8x128xi32>
    %166 = arith.cmpi sgt, %3, %165 : vector<8x128xi32>
    %167 = arith.select %166, %163, %125 : vector<8x128xi1>, vector<8x128xf32>
    %168 = arith.select %166, %161, %126 : vector<8x128xi1>, vector<8x128xf32>
    %cst_47 = arith.constant 0.000000e+00 : f32
    %169 = vector.broadcast %cst_47 : f32 to vector<8x128xf32>
    %170 = arith.select %166, %163, %169 : vector<8x128xi1>, vector<8x128xf32>
    %171 = arith.index_cast %c3_i32 : i32 to index
    %c0_48 = arith.constant 0 : index
    %c0_49 = arith.constant 0 : index
    %172 = vector.load %arg7[%171, %c0_48, %c0_49] : memref<8x8x128xf32, #tpu.memory_space<vmem>>, vector<1x8x128xf32>
    %173 = vector.shape_cast %172 : vector<1x8x128xf32> to vector<8x128xf32>
    %174 = vector.shape_cast %170 : vector<8x128xf32> to vector<1x8x128xf32>
    tpu.vector_store %arg7[%171, %c0_48, %c0_49], %174 {strides = array<i32>} : memref<8x8x128xf32, #tpu.memory_space<vmem>>, vector<1x8x128xf32>,
    %c4_i32 = arith.constant 4 : i32
    %175 = arith.index_cast %c4_i32 : i32 to index
    %c0_50 = arith.constant 0 : index
    %c0_51 = arith.constant 0 : index
    %176 = vector.load %arg2[%175, %c0_50, %c0_51] : memref<8x8x512xf32, #tpu.memory_space<vmem>>, vector<1x8x512xf32>
    %177 = vector.shape_cast %176 : vector<1x8x512xf32> to vector<8x512xf32>
    %c0_52 = arith.constant 0 : index
    %c0_53 = arith.constant 0 : index
    %178 = vector.load %arg6[%c0_52, %c0_53] : memref<128x512xf32, #tpu.memory_space<vmem>>, vector<128x512xf32>
    %cst_54 = arith.constant dense<0.000000e+00> : vector<8x512xf32>
    %179 = tpu.matmul %167, %178, %cst_54 {dimension_numbers = #tpu.dot_dimension_numbers<[1], [0], [0], [1], [0, 0, 1, 1], [], []>} : vector<8x128xf32>, vector<128x512xf32>, vector<8x512xf32> -> vector<8x512xf32>
    %180 = arith.addf %177, %179 : vector<8x512xf32>
    %181 = vector.extract_strided_slice %180 {offsets = [0, 0], sizes = [8, 128], strides = [1, 1]} : vector<8x512xf32> to vector<8x128xf32>
    %182 = arith.negf %181 : vector<8x128xf32>
    %183 = math.exp %182 : vector<8x128xf32>
    %cst_55 = arith.constant 1.000000e+00 : f32
    %184 = vector.broadcast %cst_55 : f32 to vector<8x128xf32>
    %185 = arith.addf %184, %183 : vector<8x128xf32>
    %186 = arith.divf %184, %185 : vector<8x128xf32>
    %187 = vector.extract_strided_slice %180 {offsets = [0, 128], sizes = [8, 128], strides = [1, 1]} : vector<8x512xf32> to vector<8x128xf32>
    %188 = arith.negf %187 : vector<8x128xf32>
    %189 = math.exp %188 : vector<8x128xf32>
    %cst_56 = arith.constant 1.000000e+00 : f32
    %190 = vector.broadcast %cst_56 : f32 to vector<8x128xf32>
    %191 = arith.addf %190, %189 : vector<8x128xf32>
    %192 = arith.divf %190, %191 : vector<8x128xf32>
    %193 = vector.extract_strided_slice %180 {offsets = [0, 256], sizes = [8, 128], strides = [1, 1]} : vector<8x512xf32> to vector<8x128xf32>
    %194 = math.tanh %193 : vector<8x128xf32>
    %195 = vector.extract_strided_slice %180 {offsets = [0, 384], sizes = [8, 128], strides = [1, 1]} : vector<8x512xf32> to vector<8x128xf32>
    %196 = arith.negf %195 : vector<8x128xf32>
    %197 = math.exp %196 : vector<8x128xf32>
    %cst_57 = arith.constant 1.000000e+00 : f32
    %198 = vector.broadcast %cst_57 : f32 to vector<8x128xf32>
    %199 = arith.addf %198, %197 : vector<8x128xf32>
    %200 = arith.divf %198, %199 : vector<8x128xf32>
    %201 = arith.mulf %192, %168 : vector<8x128xf32>
    %202 = arith.mulf %186, %194 : vector<8x128xf32>
    %203 = arith.addf %201, %202 : vector<8x128xf32>
    %204 = math.tanh %203 : vector<8x128xf32>
    %205 = arith.mulf %200, %204 : vector<8x128xf32>
    %206 = arith.addi %4, %c4_i32 : i32
    %207 = vector.broadcast %206 : i32 to vector<8x128xi32>
    %208 = arith.cmpi sgt, %3, %207 : vector<8x128xi32>
    %209 = arith.select %208, %205, %167 : vector<8x128xi1>, vector<8x128xf32>
    %210 = arith.select %208, %203, %168 : vector<8x128xi1>, vector<8x128xf32>
    %cst_58 = arith.constant 0.000000e+00 : f32
    %211 = vector.broadcast %cst_58 : f32 to vector<8x128xf32>
    %212 = arith.select %208, %205, %211 : vector<8x128xi1>, vector<8x128xf32>
    %213 = arith.index_cast %c4_i32 : i32 to index
    %c0_59 = arith.constant 0 : index
    %c0_60 = arith.constant 0 : index
    %214 = vector.load %arg7[%213, %c0_59, %c0_60] : memref<8x8x128xf32, #tpu.memory_space<vmem>>, vector<1x8x128xf32>
    %215 = vector.shape_cast %214 : vector<1x8x128xf32> to vector<8x128xf32>
    %216 = vector.shape_cast %212 : vector<8x128xf32> to vector<1x8x128xf32>
    tpu.vector_store %arg7[%213, %c0_59, %c0_60], %216 {strides = array<i32>} : memref<8x8x128xf32, #tpu.memory_space<vmem>>, vector<1x8x128xf32>,
    %c5_i32 = arith.constant 5 : i32
    %217 = arith.index_cast %c5_i32 : i32 to index
    %c0_61 = arith.constant 0 : index
    %c0_62 = arith.constant 0 : index
    %218 = vector.load %arg2[%217, %c0_61, %c0_62] : memref<8x8x512xf32, #tpu.memory_space<vmem>>, vector<1x8x512xf32>
    %219 = vector.shape_cast %218 : vector<1x8x512xf32> to vector<8x512xf32>
    %c0_63 = arith.constant 0 : index
    %c0_64 = arith.constant 0 : index
    %220 = vector.load %arg6[%c0_63, %c0_64] : memref<128x512xf32, #tpu.memory_space<vmem>>, vector<128x512xf32>
    %cst_65 = arith.constant dense<0.000000e+00> : vector<8x512xf32>
    %221 = tpu.matmul %209, %220, %cst_65 {dimension_numbers = #tpu.dot_dimension_numbers<[1], [0], [0], [1], [0, 0, 1, 1], [], []>} : vector<8x128xf32>, vector<128x512xf32>, vector<8x512xf32> -> vector<8x512xf32>
    %222 = arith.addf %219, %221 : vector<8x512xf32>
    %223 = vector.extract_strided_slice %222 {offsets = [0, 0], sizes = [8, 128], strides = [1, 1]} : vector<8x512xf32> to vector<8x128xf32>
    %224 = arith.negf %223 : vector<8x128xf32>
    %225 = math.exp %224 : vector<8x128xf32>
    %cst_66 = arith.constant 1.000000e+00 : f32
    %226 = vector.broadcast %cst_66 : f32 to vector<8x128xf32>
    %227 = arith.addf %226, %225 : vector<8x128xf32>
    %228 = arith.divf %226, %227 : vector<8x128xf32>
    %229 = vector.extract_strided_slice %222 {offsets = [0, 128], sizes = [8, 128], strides = [1, 1]} : vector<8x512xf32> to vector<8x128xf32>
    %230 = arith.negf %229 : vector<8x128xf32>
    %231 = math.exp %230 : vector<8x128xf32>
    %cst_67 = arith.constant 1.000000e+00 : f32
    %232 = vector.broadcast %cst_67 : f32 to vector<8x128xf32>
    %233 = arith.addf %232, %231 : vector<8x128xf32>
    %234 = arith.divf %232, %233 : vector<8x128xf32>
    %235 = vector.extract_strided_slice %222 {offsets = [0, 256], sizes = [8, 128], strides = [1, 1]} : vector<8x512xf32> to vector<8x128xf32>
    %236 = math.tanh %235 : vector<8x128xf32>
    %237 = vector.extract_strided_slice %222 {offsets = [0, 384], sizes = [8, 128], strides = [1, 1]} : vector<8x512xf32> to vector<8x128xf32>
    %238 = arith.negf %237 : vector<8x128xf32>
    %239 = math.exp %238 : vector<8x128xf32>
    %cst_68 = arith.constant 1.000000e+00 : f32
    %240 = vector.broadcast %cst_68 : f32 to vector<8x128xf32>
    %241 = arith.addf %240, %239 : vector<8x128xf32>
    %242 = arith.divf %240, %241 : vector<8x128xf32>
    %243 = arith.mulf %234, %210 : vector<8x128xf32>
    %244 = arith.mulf %228, %236 : vector<8x128xf32>
    %245 = arith.addf %243, %244 : vector<8x128xf32>
    %246 = math.tanh %245 : vector<8x128xf32>
    %247 = arith.mulf %242, %246 : vector<8x128xf32>
    %248 = arith.addi %4, %c5_i32 : i32
    %249 = vector.broadcast %248 : i32 to vector<8x128xi32>
    %250 = arith.cmpi sgt, %3, %249 : vector<8x128xi32>
    %251 = arith.select %250, %247, %209 : vector<8x128xi1>, vector<8x128xf32>
    %252 = arith.select %250, %245, %210 : vector<8x128xi1>, vector<8x128xf32>
    %cst_69 = arith.constant 0.000000e+00 : f32
    %253 = vector.broadcast %cst_69 : f32 to vector<8x128xf32>
    %254 = arith.select %250, %247, %253 : vector<8x128xi1>, vector<8x128xf32>
    %255 = arith.index_cast %c5_i32 : i32 to index
    %c0_70 = arith.constant 0 : index
    %c0_71 = arith.constant 0 : index
    %256 = vector.load %arg7[%255, %c0_70, %c0_71] : memref<8x8x128xf32, #tpu.memory_space<vmem>>, vector<1x8x128xf32>
    %257 = vector.shape_cast %256 : vector<1x8x128xf32> to vector<8x128xf32>
    %258 = vector.shape_cast %254 : vector<8x128xf32> to vector<1x8x128xf32>
    tpu.vector_store %arg7[%255, %c0_70, %c0_71], %258 {strides = array<i32>} : memref<8x8x128xf32, #tpu.memory_space<vmem>>, vector<1x8x128xf32>,
    %c6_i32 = arith.constant 6 : i32
    %259 = arith.index_cast %c6_i32 : i32 to index
    %c0_72 = arith.constant 0 : index
    %c0_73 = arith.constant 0 : index
    %260 = vector.load %arg2[%259, %c0_72, %c0_73] : memref<8x8x512xf32, #tpu.memory_space<vmem>>, vector<1x8x512xf32>
    %261 = vector.shape_cast %260 : vector<1x8x512xf32> to vector<8x512xf32>
    %c0_74 = arith.constant 0 : index
    %c0_75 = arith.constant 0 : index
    %262 = vector.load %arg6[%c0_74, %c0_75] : memref<128x512xf32, #tpu.memory_space<vmem>>, vector<128x512xf32>
    %cst_76 = arith.constant dense<0.000000e+00> : vector<8x512xf32>
    %263 = tpu.matmul %251, %262, %cst_76 {dimension_numbers = #tpu.dot_dimension_numbers<[1], [0], [0], [1], [0, 0, 1, 1], [], []>} : vector<8x128xf32>, vector<128x512xf32>, vector<8x512xf32> -> vector<8x512xf32>
    %264 = arith.addf %261, %263 : vector<8x512xf32>
    %265 = vector.extract_strided_slice %264 {offsets = [0, 0], sizes = [8, 128], strides = [1, 1]} : vector<8x512xf32> to vector<8x128xf32>
    %266 = arith.negf %265 : vector<8x128xf32>
    %267 = math.exp %266 : vector<8x128xf32>
    %cst_77 = arith.constant 1.000000e+00 : f32
    %268 = vector.broadcast %cst_77 : f32 to vector<8x128xf32>
    %269 = arith.addf %268, %267 : vector<8x128xf32>
    %270 = arith.divf %268, %269 : vector<8x128xf32>
    %271 = vector.extract_strided_slice %264 {offsets = [0, 128], sizes = [8, 128], strides = [1, 1]} : vector<8x512xf32> to vector<8x128xf32>
    %272 = arith.negf %271 : vector<8x128xf32>
    %273 = math.exp %272 : vector<8x128xf32>
    %cst_78 = arith.constant 1.000000e+00 : f32
    %274 = vector.broadcast %cst_78 : f32 to vector<8x128xf32>
    %275 = arith.addf %274, %273 : vector<8x128xf32>
    %276 = arith.divf %274, %275 : vector<8x128xf32>
    %277 = vector.extract_strided_slice %264 {offsets = [0, 256], sizes = [8, 128], strides = [1, 1]} : vector<8x512xf32> to vector<8x128xf32>
    %278 = math.tanh %277 : vector<8x128xf32>
    %279 = vector.extract_strided_slice %264 {offsets = [0, 384], sizes = [8, 128], strides = [1, 1]} : vector<8x512xf32> to vector<8x128xf32>
    %280 = arith.negf %279 : vector<8x128xf32>
    %281 = math.exp %280 : vector<8x128xf32>
    %cst_79 = arith.constant 1.000000e+00 : f32
    %282 = vector.broadcast %cst_79 : f32 to vector<8x128xf32>
    %283 = arith.addf %282, %281 : vector<8x128xf32>
    %284 = arith.divf %282, %283 : vector<8x128xf32>
    %285 = arith.mulf %276, %252 : vector<8x128xf32>
    %286 = arith.mulf %270, %278 : vector<8x128xf32>
    %287 = arith.addf %285, %286 : vector<8x128xf32>
    %288 = math.tanh %287 : vector<8x128xf32>
    %289 = arith.mulf %284, %288 : vector<8x128xf32>
    %290 = arith.addi %4, %c6_i32 : i32
    %291 = vector.broadcast %290 : i32 to vector<8x128xi32>
    %292 = arith.cmpi sgt, %3, %291 : vector<8x128xi32>
    %293 = arith.select %292, %289, %251 : vector<8x128xi1>, vector<8x128xf32>
    %294 = arith.select %292, %287, %252 : vector<8x128xi1>, vector<8x128xf32>
    %cst_80 = arith.constant 0.000000e+00 : f32
    %295 = vector.broadcast %cst_80 : f32 to vector<8x128xf32>
    %296 = arith.select %292, %289, %295 : vector<8x128xi1>, vector<8x128xf32>
    %297 = arith.index_cast %c6_i32 : i32 to index
    %c0_81 = arith.constant 0 : index
    %c0_82 = arith.constant 0 : index
    %298 = vector.load %arg7[%297, %c0_81, %c0_82] : memref<8x8x128xf32, #tpu.memory_space<vmem>>, vector<1x8x128xf32>
    %299 = vector.shape_cast %298 : vector<1x8x128xf32> to vector<8x128xf32>
    %300 = vector.shape_cast %296 : vector<8x128xf32> to vector<1x8x128xf32>
    tpu.vector_store %arg7[%297, %c0_81, %c0_82], %300 {strides = array<i32>} : memref<8x8x128xf32, #tpu.memory_space<vmem>>, vector<1x8x128xf32>,
    %c7_i32 = arith.constant 7 : i32
    %301 = arith.index_cast %c7_i32 : i32 to index
    %c0_83 = arith.constant 0 : index
    %c0_84 = arith.constant 0 : index
    %302 = vector.load %arg2[%301, %c0_83, %c0_84] : memref<8x8x512xf32, #tpu.memory_space<vmem>>, vector<1x8x512xf32>
    %303 = vector.shape_cast %302 : vector<1x8x512xf32> to vector<8x512xf32>
    %c0_85 = arith.constant 0 : index
    %c0_86 = arith.constant 0 : index
    %304 = vector.load %arg6[%c0_85, %c0_86] : memref<128x512xf32, #tpu.memory_space<vmem>>, vector<128x512xf32>
    %cst_87 = arith.constant dense<0.000000e+00> : vector<8x512xf32>
    %305 = tpu.matmul %293, %304, %cst_87 {dimension_numbers = #tpu.dot_dimension_numbers<[1], [0], [0], [1], [0, 0, 1, 1], [], []>} : vector<8x128xf32>, vector<128x512xf32>, vector<8x512xf32> -> vector<8x512xf32>
    %306 = arith.addf %303, %305 : vector<8x512xf32>
    %307 = vector.extract_strided_slice %306 {offsets = [0, 0], sizes = [8, 128], strides = [1, 1]} : vector<8x512xf32> to vector<8x128xf32>
    %308 = arith.negf %307 : vector<8x128xf32>
    %309 = math.exp %308 : vector<8x128xf32>
    %cst_88 = arith.constant 1.000000e+00 : f32
    %310 = vector.broadcast %cst_88 : f32 to vector<8x128xf32>
    %311 = arith.addf %310, %309 : vector<8x128xf32>
    %312 = arith.divf %310, %311 : vector<8x128xf32>
    %313 = vector.extract_strided_slice %306 {offsets = [0, 128], sizes = [8, 128], strides = [1, 1]} : vector<8x512xf32> to vector<8x128xf32>
    %314 = arith.negf %313 : vector<8x128xf32>
    %315 = math.exp %314 : vector<8x128xf32>
    %cst_89 = arith.constant 1.000000e+00 : f32
    %316 = vector.broadcast %cst_89 : f32 to vector<8x128xf32>
    %317 = arith.addf %316, %315 : vector<8x128xf32>
    %318 = arith.divf %316, %317 : vector<8x128xf32>
    %319 = vector.extract_strided_slice %306 {offsets = [0, 256], sizes = [8, 128], strides = [1, 1]} : vector<8x512xf32> to vector<8x128xf32>
    %320 = math.tanh %319 : vector<8x128xf32>
    %321 = vector.extract_strided_slice %306 {offsets = [0, 384], sizes = [8, 128], strides = [1, 1]} : vector<8x512xf32> to vector<8x128xf32>
    %322 = arith.negf %321 : vector<8x128xf32>
    %323 = math.exp %322 : vector<8x128xf32>
    %cst_90 = arith.constant 1.000000e+00 : f32
    %324 = vector.broadcast %cst_90 : f32 to vector<8x128xf32>
    %325 = arith.addf %324, %323 : vector<8x128xf32>
    %326 = arith.divf %324, %325 : vector<8x128xf32>
    %327 = arith.mulf %318, %294 : vector<8x128xf32>
    %328 = arith.mulf %312, %320 : vector<8x128xf32>
    %329 = arith.addf %327, %328 : vector<8x128xf32>
    %330 = math.tanh %329 : vector<8x128xf32>
    %331 = arith.mulf %326, %330 : vector<8x128xf32>
    %332 = arith.addi %4, %c7_i32 : i32
    %333 = vector.broadcast %332 : i32 to vector<8x128xi32>
    %334 = arith.cmpi sgt, %3, %333 : vector<8x128xi32>
    %335 = arith.select %334, %331, %293 : vector<8x128xi1>, vector<8x128xf32>
    %336 = arith.select %334, %329, %294 : vector<8x128xi1>, vector<8x128xf32>
    %cst_91 = arith.constant 0.000000e+00 : f32
    %337 = vector.broadcast %cst_91 : f32 to vector<8x128xf32>
    %338 = arith.select %334, %331, %337 : vector<8x128xi1>, vector<8x128xf32>
    %339 = arith.index_cast %c7_i32 : i32 to index
    %c0_92 = arith.constant 0 : index
    %c0_93 = arith.constant 0 : index
    %340 = vector.load %arg7[%339, %c0_92, %c0_93] : memref<8x8x128xf32, #tpu.memory_space<vmem>>, vector<1x8x128xf32>
    %341 = vector.shape_cast %340 : vector<1x8x128xf32> to vector<8x128xf32>
    %342 = vector.shape_cast %338 : vector<8x128xf32> to vector<1x8x128xf32>
    tpu.vector_store %arg7[%339, %c0_92, %c0_93], %342 {strides = array<i32>} : memref<8x8x128xf32, #tpu.memory_space<vmem>>, vector<1x8x128xf32>,
    %c8_i32_94 = arith.constant 8 : i32
    %c0_95 = arith.constant 0 : index
    %c0_96 = arith.constant 0 : index
    %343 = vector.load %arg10[%c0_95, %c0_96] : memref<8x128xf32, #tpu.memory_space<vmem>>, vector<8x128xf32>
    tpu.vector_store %arg10[%c0_95, %c0_96], %335 {strides = array<i32>} : memref<8x128xf32, #tpu.memory_space<vmem>>, vector<8x128xf32>,
    %c0_97 = arith.constant 0 : index
    %c0_98 = arith.constant 0 : index
    %344 = vector.load %arg11[%c0_97, %c0_98] : memref<8x128xf32, #tpu.memory_space<vmem>>, vector<8x128xf32>
    tpu.vector_store %arg11[%c0_97, %c0_98], %336 {strides = array<i32>} : memref<8x128xf32, #tpu.memory_space<vmem>>, vector<8x128xf32>,
    %c0_i32_99 = arith.constant 0 : i32
    %345 = arith.cmpi eq, %arg1, %c0_i32_99 : i32
    %346 = arith.extui %345 : i1 to i32
    %c0_i32_100 = arith.constant 0 : i32
    %347 = arith.cmpi ne, %346, %c0_i32_100 : i32
    scf.if %347 {
      %c0_101 = arith.constant 0 : index
      %c0_102 = arith.constant 0 : index
      %c0_103 = arith.constant 0 : index
      %348 = vector.load %arg8[%c0_101, %c0_102, %c0_103] : memref<1x8x128xf32, #tpu.memory_space<vmem>>, vector<1x8x128xf32>
      %349 = vector.shape_cast %348 : vector<1x8x128xf32> to vector<8x128xf32>
      %350 = vector.shape_cast %335 : vector<8x128xf32> to vector<1x8x128xf32>
      tpu.vector_store %arg8[%c0_101, %c0_102, %c0_103], %350 {strides = array<i32>} : memref<1x8x128xf32, #tpu.memory_space<vmem>>, vector<1x8x128xf32>,
      %c0_104 = arith.constant 0 : index
      %c0_105 = arith.constant 0 : index
      %c0_106 = arith.constant 0 : index
      %351 = vector.load %arg9[%c0_104, %c0_105, %c0_106] : memref<1x8x128xf32, #tpu.memory_space<vmem>>, vector<1x8x128xf32>
      %352 = vector.shape_cast %351 : vector<1x8x128xf32> to vector<8x128xf32>
      %353 = vector.shape_cast %336 : vector<8x128xf32> to vector<1x8x128xf32>
      tpu.vector_store %arg9[%c0_104, %c0_105, %c0_106], %353 {strides = array<i32>} : memref<1x8x128xf32, #tpu.memory_space<vmem>>, vector<1x8x128xf32>,
    } else {
    }
    return
  }
  func.func @transform_0(%arg0: i32, %arg1: i32) -> (i32, i32, i32) {
    %c0_i32 = arith.constant 0 : i32
    %c0_i32_0 = arith.constant 0 : i32
    return %arg1, %arg0, %c0_i32 : i32, i32, i32
  }
  func.func @transform_1(%arg0: i32, %arg1: i32) -> (i32, i32, i32) {
    %c0_i32 = arith.constant 0 : i32
    %c0_i32_0 = arith.constant 0 : i32
    %c0_i32_1 = arith.constant 0 : i32
    return %c0_i32, %arg0, %c0_i32_0 : i32, i32, i32
  }
  func.func @transform_2(%arg0: i32, %arg1: i32) -> (i32, i32, i32) {
    %c0_i32 = arith.constant 0 : i32
    %c0_i32_0 = arith.constant 0 : i32
    %c0_i32_1 = arith.constant 0 : i32
    return %c0_i32, %arg0, %c0_i32_0 : i32, i32, i32
  }
  func.func @transform_3(%arg0: i32, %arg1: i32) -> (i32, i32) {
    %c0_i32 = arith.constant 0 : i32
    %c0_i32_0 = arith.constant 0 : i32
    return %arg0, %c0_i32 : i32, i32
  }
  func.func @transform_4(%arg0: i32, %arg1: i32) -> (i32, i32) {
    %c0_i32 = arith.constant 0 : i32
    %c0_i32_0 = arith.constant 0 : i32
    %c0_i32_1 = arith.constant 0 : i32
    return %c0_i32, %c0_i32_0 : i32, i32
  }
  func.func @transform_5(%arg0: i32, %arg1: i32) -> (i32, i32, i32) {
    %c0_i32 = arith.constant 0 : i32
    %c0_i32_0 = arith.constant 0 : i32
    return %arg1, %arg0, %c0_i32 : i32, i32, i32
  }
  func.func @transform_6(%arg0: i32, %arg1: i32) -> (i32, i32, i32) {
    %c0_i32 = arith.constant 0 : i32
    %c0_i32_0 = arith.constant 0 : i32
    %c0_i32_1 = arith.constant 0 : i32
    return %c0_i32, %arg0, %c0_i32_0 : i32, i32, i32
  }
  func.func @transform_7(%arg0: i32, %arg1: i32) -> (i32, i32, i32) {
    %c0_i32 = arith.constant 0 : i32
    %c0_i32_0 = arith.constant 0 : i32
    %c0_i32_1 = arith.constant 0 : i32
    return %c0_i32, %arg0, %c0_i32_0 : i32, i32, i32
  }
}

</mosaic_0001>

<bundles_post_ra>
// kernel: rnn_encoder_forward.1
= control target key start
LH: loop header
LB: loop body
LE: loop exit
PB: predicated region body
PF: predicated region fallthrough
CT: control target
= control target key end

     0   :  { %v3692_v3 = vmov 0.0   ;;  %s3684_s4 = inlined_call_operand.vmem [shape: f32[128,512], index: 4, kind: input, shape index: {}]   ;;  %s3685_s1 = inlined_call_operand.vmem [shape: f32[1,8,128], index: 1, kind: input, shape index: {}]   ;;  %s3686_s0 = inlined_call_operand.vmem [shape: f32[8,8,512], index: 0, kind: input, shape index: {}]   ;;  %s3687_s2 = inlined_call_operand.vmem [shape: f32[1,8,128], index: 2, kind: input, shape index: {}]   ;;  %s3688_s3 = inlined_call_operand.vmem [shape: s32[8,128], index: 3, kind: input, shape index: {}]   ;;  %s3689_s5 = inlined_call_operand.vmem [shape: f32[8,8,128], index: 5, kind: output, shape index: {0}]   ;;  %s3690_s7 = inlined_call_operand.vmem [shape: f32[1,8,128], index: 7, kind: output, shape index: {2}]   ;;  %s3691_s6 = inlined_call_operand.vmem [shape: f32[1,8,128], index: 6, kind: output, shape index: {1}]  }
   0x1   :  { %v2260_v0 = vld [vmem:[%s3684_s4 + $0x1e8] sm:$0xff]  ;;  %v2265_v1 = vld [vmem:[%s3684_s4 + $0x1e0] sm:$0xff]  ;;  %167 = vmatprep.mubr.f32.mxu0 %v3692_v3  ;;  %238 = vmatprep.mubr.f32.mxu1 %v3692_v3  ;;  %v2307_v9 = vld [vmem:[%s3684_s4 + $0x1f8] sm:$0xff] }
   0x2   :  { %3761 = vst [vmem:[#allocation4_spill] sm:$0xff] %v2260_v0  ;;  %v2270_v2 = vld [vmem:[%s3684_s4 + $0x1c8] sm:$0xff]  ;;  %103 = vmatprep.subr.mxu0 %v2260_v0  ;;  %v2278_v4 = vld [vmem:[%s3684_s4 + $0x1c0] sm:$0xff]  ;;  %3762 = vst [vmem:[#allocation5_spill] sm:$0xff] %v2307_v9  ;;  %174 = vmatprep.subr.mxu1 %v2307_v9 }
   0x3   :  { %104 = vmatpush1.msra.mxu0 %v2265_v1  ;;  %v2284_v5 = vld [vmem:[%s3684_s4 + $0x1a8] sm:$0xff]  ;;  %v2290_v6 = vld [vmem:[%s3684_s4 + $0x1a0] sm:$0xff]  ;;  %v2319_v11 = vld [vmem:[%s3684_s4 + $0x1f0] sm:$0xff] }
   0x4   :  { %105 = vmatprep.subr.mxu0 %v2270_v2  ;;  %v2296_v7 = vld [vmem:[%s3684_s4 + $0x188] sm:$0xff]  ;;  %v2302_v8 = vld [vmem:[%s3684_s4 + $0x180] sm:$0xff]  ;;  %175 = vmatpush1.msra.mxu1 %v2319_v11  ;;  %v2331_v13 = vld [vmem:[%s3684_s4 + $0x1d8] sm:$0xff] }
   0x5   :  { %106 = vmatpush1.msra.mxu0 %v2278_v4  ;;  %v2313_v10 = vld [vmem:[%s3684_s4 + $0x168] sm:$0xff]  ;;  %v2325_v12 = vld [vmem:[%s3684_s4 + $0x160] sm:$0xff]  ;;  %v2336_v14 = vld [vmem:[%s3684_s4 + $0x1d0] sm:$0xff]  ;;  %176 = vmatprep.subr.mxu1 %v2331_v13 }
   0x6   :  { %107 = vmatprep.subr.mxu0 %v2284_v5  ;;  %v2342_v15 = vld [vmem:[%s3684_s4 + $0x148] sm:$0xff]  ;;  %v2348_v16 = vld [vmem:[%s3684_s4 + $0x1b8] sm:$0xff]  ;;  %v2354_v17 = vld [vmem:[%s3684_s4 + $0x140] sm:$0xff]  ;;  %177 = vmatpush1.msra.mxu1 %v2336_v14 }
   0x7   :  { %108 = vmatpush1.msra.mxu0 %v2290_v6  ;;  %v2360_v18 = vld [vmem:[%s3684_s4 + $0x1b0] sm:$0xff]  ;;  %v2365_v19 = vld [vmem:[%s3684_s4 + $0x198] sm:$0xff]  ;;  %v2371_v20 = vld [vmem:[%s3684_s4 + $0x128] sm:$0xff]  ;;  %178 = vmatprep.subr.mxu1 %v2348_v16 }
   0x8   :  { %109 = vmatprep.subr.mxu0 %v2296_v7  ;;  %v2377_v21 = vld [vmem:[%s3684_s4 + $0x190] sm:$0xff]  ;;  %v2383_v22 = vld [vmem:[%s3684_s4 + $0x120] sm:$0xff]  ;;  %179 = vmatpush1.msra.mxu1 %v2360_v18  ;;  %v2389_v23 = vld [vmem:[%s3684_s4 + $0x178] sm:$0xff] }
   0x9   :  { %110 = vmatpush1.msra.mxu0 %v2302_v8  ;;  %v2395_v24 = vld [vmem:[%s3684_s4 + $0x108] sm:$0xff]  ;;  %180 = vmatprep.subr.mxu1 %v2365_v19  ;;  %v2401_v25 = vld [vmem:[%s3684_s4 + $0x170] sm:$0xff]  ;;  %v2407_v26 = vld [vmem:[%s3684_s4 + $0x100] sm:$0xff] }
   0xa   :  { %111 = vmatprep.subr.mxu0 %v2313_v10  ;;  %181 = vmatpush1.msra.mxu1 %v2377_v21  ;;  %v2413_v27 = vld [vmem:[%s3684_s4 + $0x158] sm:$0xff]  ;;  %v2419_v28 = vld [vmem:[%s3684_s4 + $0xe8] sm:$0xff]  ;;  %v2425_v29 = vld [vmem:[%s3684_s4 + $0x150] sm:$0xff] }
   0xb   :  { %112 = vmatpush1.msra.mxu0 %v2325_v12  ;;  %182 = vmatprep.subr.mxu1 %v2389_v23  ;;  %v2431_v30 = vld [vmem:[%s3684_s4 + $0xe0] sm:$0xff]  ;;  %v2437_v31 = vld [vmem:[%s3684_s4 + $0x138] sm:$0xff]  ;;  %v2443_v32 = vld [vmem:[%s3684_s4 + $0xc8] sm:$0xff] }
   0xc   :  { %113 = vmatprep.subr.mxu0 %v2342_v15  ;;  %183 = vmatpush1.msra.mxu1 %v2401_v25  ;;  %v2449_v33 = vld [vmem:[%s3684_s4 + $0x130] sm:$0xff]  ;;  %v2455_v34 = vld [vmem:[%s3684_s4 + $0xc0] sm:$0xff]  ;;  %v2461_v35 = vld [vmem:[%s3684_s4 + $0x118] sm:$0xff] }
   0xd   :  { %114 = vmatpush1.msra.mxu0 %v2354_v17  ;;  %184 = vmatprep.subr.mxu1 %v2413_v27  ;;  %v2467_v36 = vld [vmem:[%s3684_s4 + $0xa8] sm:$0xff]  ;;  %v2473_v37 = vld [vmem:[%s3684_s4 + $0x110] sm:$0xff]  ;;  %v2479_v38 = vld [vmem:[%s3684_s4 + $0xa0] sm:$0xff] }
   0xe   :  { %115 = vmatprep.subr.mxu0 %v2371_v20  ;;  %185 = vmatpush1.msra.mxu1 %v2425_v29  ;;  %v2485_v39 = vld [vmem:[%s3684_s4 + $0xf8] sm:$0xff]  ;;  %v2491_v40 = vld [vmem:[%s3684_s4 + $0x88] sm:$0xff]  ;;  %v2497_v41 = vld [vmem:[%s3684_s4 + $0xf0] sm:$0xff] }
   0xf   :  { %116 = vmatpush1.msra.mxu0 %v2383_v22  ;;  %186 = vmatprep.subr.mxu1 %v2437_v31  ;;  %v2503_v42 = vld [vmem:[%s3684_s4 + $0x80] sm:$0xff]  ;;  %v2509_v43 = vld [vmem:[%s3684_s4 + $0xd8] sm:$0xff]  ;;  %v2515_v44 = vld [vmem:[%s3684_s4 + $0x68] sm:$0xff] }
  0x10   :  { %117 = vmatprep.subr.mxu0 %v2395_v24  ;;  %187 = vmatpush1.msra.mxu1 %v2449_v33  ;;  %v2521_v45 = vld [vmem:[%s3684_s4 + $0xd0] sm:$0xff]  ;;  %v2527_v46 = vld [vmem:[%s3684_s4 + $0x60] sm:$0xff]  ;;  %v2533_v47 = vld [vmem:[%s3684_s4 + $0xb8] sm:$0xff] }
  0x11   :  { %118 = vmatpush1.msra.mxu0 %v2407_v26  ;;  %188 = vmatprep.subr.mxu1 %v2461_v35  ;;  %3763 = vst [vmem:[#allocation6_spill] sm:$0xff] %v2527_v46  ;;  %v2539_v48 = vld [vmem:[%s3684_s4 + $0x48] sm:$0xff]  ;;  %v2545_v49 = vld [vmem:[%s3684_s4 + $0xb0] sm:$0xff]  ;;  %v2551_v50 = vld [vmem:[%s3684_s4 + $0x40] sm:$0xff] }
  0x12   :  { %119 = vmatprep.subr.mxu0 %v2419_v28  ;;  %189 = vmatpush1.msra.mxu1 %v2473_v37  ;;  %3764 = vst [vmem:[#allocation7_spill] sm:$0xff] %v2539_v48  ;;  %3765 = vst [vmem:[#allocation8_spill] sm:$0xff] %v2551_v50  ;;  %v2557_v51 = vld [vmem:[%s3684_s4 + $0x98] sm:$0xff]  ;;  %v2563_v52 = vld [vmem:[%s3684_s4 + $0x28] sm:$0xff] }
  0x13   :  { %120 = vmatpush1.msra.mxu0 %v2431_v30  ;;  %190 = vmatprep.subr.mxu1 %v2485_v39  ;;  %3766 = vst [vmem:[#allocation9_spill] sm:$0xff] %v2563_v52  ;;  %v2569_v53 = vld [vmem:[%s3684_s4 + $0x90] sm:$0xff]  ;;  %v2575_v54 = vld [vmem:[%s3684_s4 + $0x20] sm:$0xff]  ;;  %v2581_v55 = vld [vmem:[%s3684_s4 + $0x78] sm:$0xff] }
  0x14   :  { %121 = vmatprep.subr.mxu0 %v2443_v32  ;;  %191 = vmatpush1.msra.mxu1 %v2497_v41  ;;  %3767 = vst [vmem:[#allocation10_spill] sm:$0xff] %v2575_v54  ;;  %3768 = vst [vmem:[#allocation11_spill] sm:$0xff] %v2581_v55  ;;  %v2587_v56 = vld [vmem:[%s3684_s4 + $0x8] sm:$0xff]  ;;  %v2593_v57 = vld [vmem:[%s3684_s4 + $0x70] sm:$0xff] }
  0x15   :  { %122 = vmatpush1.msra.mxu0 %v2455_v34  ;;  %192 = vmatprep.subr.mxu1 %v2509_v43  ;;  %3769 = vst [vmem:[#allocation12_spill] sm:$0xff] %v2587_v56  ;;  %3770 = vst [vmem:[#allocation13_spill] sm:$0xff] %v2593_v57  ;;  %v2599_v58 = vld [vmem:[%s3684_s4] sm:$0xff]  ;;  %v2605_v59 = vld [vmem:[%s3684_s4 + $0x58] sm:$0xff] }
  0x16   :  { %123 = vmatprep.subr.mxu0 %v2467_v36  ;;  %193 = vmatpush1.msra.mxu1 %v2521_v45  ;;  %3771 = vst [vmem:[#allocation14_spill] sm:$0xff] %v2599_v58  ;;  %3772 = vst [vmem:[#allocation15_spill] sm:$0xff] %v2605_v59  ;;  %v2611_v60 = vld [vmem:[%s3685_s1] sm:$0xff]  ;;  %v2617_v61 = vld [vmem:[%s3684_s4 + $0x50] sm:$0xff] }
  0x17   :  { %124 = vmatpush1.msra.mxu0 %v2479_v38  ;;  %194 = vmatprep.subr.mxu1 %v2533_v47  ;;  %3773 = vst [vmem:[#allocation16_spill] sm:$0xff] %v2617_v61  ;;  %v2624_v62 = vld [vmem:[%s3684_s4 + $0x38] sm:$0xff]  ;;  %v2631_v63 = vld [vmem:[%s3684_s4 + $0x30] sm:$0xff] }
  0x18   :  { %125 = vmatprep.subr.mxu0 %v2491_v40  ;;  %195 = vmatpush1.msra.mxu1 %v2545_v49  ;;  %3774 = vst [vmem:[#allocation17_spill] sm:$0xff] %v2624_v62  ;;  %3775 = vst [vmem:[#allocation18_spill] sm:$0xff] %v2631_v63  ;;  %v2638_v3 = vld [vmem:[%s3684_s4 + $0x18] sm:$0xff] }
  0x19   :  { %126 = vmatpush1.msra.mxu0 %v2503_v42  ;;  %196 = vmatprep.subr.mxu1 %v2557_v51  ;;  %3776 = vst [vmem:[#allocation19_spill] sm:$0xff] %v2638_v3 }
  0x1a   :  { %127 = vmatprep.subr.mxu0 %v2515_v44  ;;  %197 = vmatpush1.msra.mxu1 %v2569_v53 }
  0x1b   :  { %128 = vmatpush1.msra.mxu0 %v2527_v46  ;;  %198 = vmatprep.subr.mxu1 %v2581_v55 }
  0x1c   :  { %129 = vmatprep.subr.mxu0 %v2539_v48  ;;  %199 = vmatpush1.msra.mxu1 %v2593_v57 }
  0x1d   :  { %130 = vmatpush1.msra.mxu0 %v2551_v50  ;;  %200 = vmatprep.subr.mxu1 %v2605_v59 }
  0x1e   :  { %131 = vmatprep.subr.mxu0 %v2563_v52  ;;  %201 = vmatpush1.msra.mxu1 %v2617_v61 }
  0x1f   :  { %132 = vmatpush1.msra.mxu0 %v2575_v54  ;;  %202 = vmatprep.subr.mxu1 %v2624_v62 }
  0x20   :  { %133 = vmatprep.subr.mxu0 %v2587_v56  ;;  %203 = vmatpush1.msra.mxu1 %v2631_v63 }
  0x21   :  { %134 = vmatpush1.msra.mxu0 %v2599_v58  ;;  %v2644_v58 = vld [vmem:[%s3684_s4 + $0x10] sm:$0xff]  ;;  %204 = vmatprep.subr.mxu1 %v2638_v3 }
  0x22   :  { %168 = vmatmul.mubr.f32.vlgmr.msra.gmra.mxu0 %v2611_v60  ;;  %3777 = vst [vmem:[#allocation20_spill] sm:$0xff] %v2644_v58  ;;  %348 = vmatprep.subr.mxu0 %v2260_v0 }
  0x23   :  { %349 = vmatpush1.msra.mxu0 %v2265_v1  ;;  %205 = vmatpush1.msra.mxu1 %v2644_v58 }
  0x24   :  { %350 = vmatprep.subr.mxu0 %v2270_v2  ;;  %239 = vmatmul.mubr.f32.vlgmr.msra.gmra.mxu1 %v2611_v60 }
  0x25   :  { %351 = vmatpush1.msra.mxu0 %v2278_v4  ;;  %419 = vmatprep.subr.mxu1 %v2307_v9 }
  0x26   :  { %420 = vmatpush1.msra.mxu1 %v2319_v11  ;;  %352 = vmatprep.subr.mxu0 %v2284_v5 }
  0x27   :  { %421 = vmatprep.subr.mxu1 %v2331_v13  ;;  %353 = vmatpush1.msra.mxu0 %v2290_v6 }
  0x28   :  { %422 = vmatpush1.msra.mxu1 %v2336_v14  ;;  %354 = vmatprep.subr.mxu0 %v2296_v7 }
  0x29   :  { %423 = vmatprep.subr.mxu1 %v2348_v16  ;;  %355 = vmatpush1.msra.mxu0 %v2302_v8 }
  0x2a   :  { %424 = vmatpush1.msra.mxu1 %v2360_v18  ;;  %356 = vmatprep.subr.mxu0 %v2313_v10 }
  0x2b   :  { %425 = vmatprep.subr.mxu1 %v2365_v19  ;;  %357 = vmatpush1.msra.mxu0 %v2325_v12 }
  0x2c   :  { %426 = vmatpush1.msra.mxu1 %v2377_v21  ;;  %358 = vmatprep.subr.mxu0 %v2342_v15 }
  0x2d   :  { %427 = vmatprep.subr.mxu1 %v2389_v23  ;;  %359 = vmatpush1.msra.mxu0 %v2354_v17 }
  0x2e   :  { %428 = vmatpush1.msra.mxu1 %v2401_v25  ;;  %360 = vmatprep.subr.mxu0 %v2371_v20 }
  0x2f   :  { %429 = vmatprep.subr.mxu1 %v2413_v27  ;;  %361 = vmatpush1.msra.mxu0 %v2383_v22 }
  0x30   :  { %430 = vmatpush1.msra.mxu1 %v2425_v29  ;;  %362 = vmatprep.subr.mxu0 %v2395_v24 }
  0x31   :  { %431 = vmatprep.subr.mxu1 %v2437_v31  ;;  %363 = vmatpush1.msra.mxu0 %v2407_v26 }
  0x32   :  { %432 = vmatpush1.msra.mxu1 %v2449_v33  ;;  %364 = vmatprep.subr.mxu0 %v2419_v28 }
  0x33   :  { %433 = vmatprep.subr.mxu1 %v2461_v35  ;;  %365 = vmatpush1.msra.mxu0 %v2431_v30 }
  0x34   :  { %434 = vmatpush1.msra.mxu1 %v2473_v37  ;;  %366 = vmatprep.subr.mxu0 %v2443_v32 }
  0x35   :  { %435 = vmatprep.subr.mxu1 %v2485_v39  ;;  %367 = vmatpush1.msra.mxu0 %v2455_v34 }
  0x36   :  { %436 = vmatpush1.msra.mxu1 %v2497_v41  ;;  %368 = vmatprep.subr.mxu0 %v2467_v36 }
  0x37   :  { %437 = vmatprep.subr.mxu1 %v2509_v43  ;;  %369 = vmatpush1.msra.mxu0 %v2479_v38 }
  0x38   :  { %438 = vmatpush1.msra.mxu1 %v2521_v45  ;;  %370 = vmatprep.subr.mxu0 %v2491_v40 }
  0x39   :  { %439 = vmatprep.subr.mxu1 %v2533_v47  ;;  %371 = vmatpush1.msra.mxu0 %v2503_v42 }
  0x3a   :  { %440 = vmatpush1.msra.mxu1 %v2545_v49  ;;  %372 = vmatprep.subr.mxu0 %v2515_v44 }
  0x3b   :  { %441 = vmatprep.subr.mxu1 %v2557_v51  ;;  %373 = vmatpush1.msra.mxu0 %v2527_v46  ;;  %v3778_v46 = vld [vmem:[#allocation14_spill] sm:$0xff] }
  0x3c   :  { %442 = vmatpush1.msra.mxu1 %v2569_v53  ;;  %374 = vmatprep.subr.mxu0 %v2539_v48  ;;  %v3779_v48 = vmov 0.0  }
  0x3d   :  { %443 = vmatprep.subr.mxu1 %v2581_v55  ;;  %375 = vmatpush1.msra.mxu0 %v2551_v50 }
  0x3e   :  { %444 = vmatpush1.msra.mxu1 %v2593_v57  ;;  %376 = vmatprep.subr.mxu0 %v2563_v52 }
  0x3f   :  { %445 = vmatprep.subr.mxu1 %v2605_v59  ;;  %377 = vmatpush1.msra.mxu0 %v2575_v54 }
  0x40   :  { %446 = vmatpush1.msra.mxu1 %v2617_v61  ;;  %378 = vmatprep.subr.mxu0 %v2587_v56  ;;  %v35_v56 = vld [vmem:[%s3686_s0] sm:$0xff]  ;;  %v37_v61 = vld [vmem:[%s3686_s0 + $0x10] sm:$0xff] }
  0x41   :  { %447 = vmatprep.subr.mxu1 %v2624_v62  ;;  %379 = vmatpush1.msra.mxu0 %v3778_v46  ;;  %v36_v46 = vld [vmem:[%s3686_s0 + $0x8] sm:$0xff] }
  0x42   :  { %448 = vmatpush1.msra.mxu1 %v2631_v63  ;;  %412 = vmatprep.mubr.f32.mxu0 %v3779_v48 }
  0x43   :  { %449 = vmatprep.subr.mxu1 %v2638_v3  ;;  %483 = vmatprep.mubr.f32.mxu1 %v3779_v48 }
  0x44   :  { %450 = vmatpush1.msra.mxu1 %v2644_v58  ;;  %595 = vmatprep.subr.mxu0 %v2260_v0 }
  0x45   :  { %666 = vmatprep.subr.mxu1 %v2307_v9  ;;  %v38_v9 = vld [vmem:[%s3686_s0 + $0x18] sm:$0xff] }
  0xe2   :  { %v169_v54 = vpop.f32.mrf.mxu0 }
  0xe3   :  { %v245_v63 = vadd.f32 %v169_v54, %v35_v56 }
  0xe4   :  { %v171_v62 = vpop.f32.mrf.mxu0  ;;  %v240_v58 = vpop.f32.mrf.mxu1 }
  0xe5   :  { %v2027_v3 = vmul.f32 -1.442695, %v245_v63  ;;  %v246_v52 = vadd.f32 %v171_v62, %v36_v46  ;;  %v247_v59 = vadd.f32 %v240_v58, %v37_v61  ;;  %v29_v63 = vld [vmem:[%s3687_s2] sm:$0xff] }
  0xe6   :  { %v242_v0 = vpop.f32.mrf.mxu1 }
  0xe7   :  { %2087 = vpow2.f32 %v2027_v3  ;;  %v2028_v48 = vmul.f32 -1.442695, %v246_v52  ;;  %v248_v50 = vadd.f32 %v242_v0, %v38_v9  ;;  %v2736_v0 = vld [vmem:[%s3688_s3] sm:$0xff] }
  0xe8   :  { %vm274_vm0 = vcmp.gt.s32.totalorder %v2736_v0, 0  ;;  %vm520_vm1 = vcmp.gt.s32.totalorder %v2736_v0, 1  ;;  %vm767_vm2 = vcmp.gt.s32.totalorder %v2736_v0, 2  ;;  %vm1014_vm3 = vcmp.gt.s32.totalorder %v2736_v0, 3 }
  0xe9   :  { %2089 = vpow2.f32 %v2028_v48  ;;  %v2029_v57 = vmul.f32 -1.442695, %v248_v50 }
  0xea   :  { %2091 = vtanh.f32 %v247_v59 }
  0xeb   :  { %2093 = vpow2.f32 %v2029_v57 }
  0xf4   :  { %v2088_v54 = vpop.eup %2087 }
  0xf5   :  { %v252_v56 = vadd.f32 1.0, %v2088_v54 }
  0xf6   :  { %v2090_v46 = vpop.eup %2089 }
  0xf7   :  { %2095 = vrcp.f32 %v252_v56  ;;  %v258_v3 = vadd.f32 1.0, %v2090_v46  ;;  %v2092_v48 = vpop.eup %2091 }
  0xf8   :  { %v2094_v52 = vpop.eup %2093 }
  0xf9   :  { %2097 = vrcp.f32 %v258_v3  ;;  %v265_v50 = vadd.f32 1.0, %v2094_v52 }
  0xfb   :  { %2099 = vrcp.f32 %v265_v50 }
 0x104   :  { %v2096_v62 = vpop.eup %2095 }
 0x105   :  { %v269_v59 = vmul.f32 %v2096_v62, %v2092_v48  ;;  %v2031_v48 = vld [vmem:[%s3686_s0 + $0x28] sm:$0xff] }
 0x106   :  { %v2098_v9 = vpop.eup %2097 }
 0x107   :  { %v268_v58 = vmul.f32 %v2098_v9, %v29_v63 }
 0x108   :  { %v2100_v54 = vpop.eup %2099 }
 0x109   :  { %v270_v57 = vadd.f32 %v269_v59, %v268_v58  ;;  %v2033_v59 = vld [vmem:[%s3686_s0 + $0x38] sm:$0xff] }
 0x10b   :  { %2101 = vtanh.f32 %v270_v57  ;;  %v2739_v61 = vsel %vm274_vm0, %v270_v57, %v29_v63 }
 0x118   :  { %v2102_v56 = vpop.eup %2101 }
 0x119   :  { %v272_v46 = vmul.f32 %v2102_v56, %v2100_v54  ;;  %v2032_v56 = vld [vmem:[%s3686_s0 + $0x30] sm:$0xff] }
 0x11b   :  { %v2742_v3 = vsel %vm274_vm0, %v272_v46, %v2611_v60  ;;  %v277_v55 = vsel %vm274_vm0, %v272_v46, 0.0 }
 0x11c   :  { %278 = vst [vmem:[%s3689_s5] sm:$0xff] %v277_v55  ;;  %413 = vmatmul.mubr.f32.vlgmr.msra.gmra.mxu0 %v2742_v3  ;;  %484 = vmatmul.mubr.f32.vlgmr.msra.gmra.mxu1 %v2742_v3  ;;  %v2030_v55 = vld [vmem:[%s3686_s0 + $0x20] sm:$0xff] }
 0x11d   :  { %596 = vmatpush1.msra.mxu0 %v2265_v1  ;;  %667 = vmatpush1.msra.mxu1 %v2319_v11 }
 0x11e   :  { %597 = vmatprep.subr.mxu0 %v2270_v2  ;;  %668 = vmatprep.subr.mxu1 %v2331_v13 }
 0x11f   :  { %598 = vmatpush1.msra.mxu0 %v2278_v4  ;;  %669 = vmatpush1.msra.mxu1 %v2336_v14 }
 0x120   :  { %599 = vmatprep.subr.mxu0 %v2284_v5  ;;  %670 = vmatprep.subr.mxu1 %v2348_v16 }
 0x121   :  { %600 = vmatpush1.msra.mxu0 %v2290_v6  ;;  %671 = vmatpush1.msra.mxu1 %v2360_v18 }
 0x122   :  { %601 = vmatprep.subr.mxu0 %v2296_v7  ;;  %672 = vmatprep.subr.mxu1 %v2365_v19 }
 0x123   :  { %602 = vmatpush1.msra.mxu0 %v2302_v8  ;;  %673 = vmatpush1.msra.mxu1 %v2377_v21  ;;  %v3780_v8 = vld [vmem:[#allocation11_spill] sm:$0xff] }
 0x124   :  { %603 = vmatprep.subr.mxu0 %v2313_v10  ;;  %674 = vmatprep.subr.mxu1 %v2389_v23  ;;  %v3781_v10 = vld [vmem:[#allocation6_spill] sm:$0xff] }
 0x125   :  { %604 = vmatpush1.msra.mxu0 %v2325_v12  ;;  %675 = vmatpush1.msra.mxu1 %v2401_v25  ;;  %v3782_v12 = vld [vmem:[#allocation13_spill] sm:$0xff] }
 0x126   :  { %605 = vmatprep.subr.mxu0 %v2342_v15  ;;  %676 = vmatprep.subr.mxu1 %v2413_v27  ;;  %v3783_v15 = vld [vmem:[#allocation7_spill] sm:$0xff] }
 0x127   :  { %606 = vmatpush1.msra.mxu0 %v2354_v17  ;;  %677 = vmatpush1.msra.mxu1 %v2425_v29  ;;  %v3784_v17 = vld [vmem:[#allocation15_spill] sm:$0xff] }
 0x128   :  { %607 = vmatprep.subr.mxu0 %v2371_v20  ;;  %678 = vmatprep.subr.mxu1 %v2437_v31  ;;  %v3785_v20 = vld [vmem:[#allocation8_spill] sm:$0xff] }
 0x129   :  { %608 = vmatpush1.msra.mxu0 %v2383_v22  ;;  %679 = vmatpush1.msra.mxu1 %v2449_v33  ;;  %v3786_v22 = vld [vmem:[#allocation16_spill] sm:$0xff] }
 0x12a   :  { %609 = vmatprep.subr.mxu0 %v2395_v24  ;;  %680 = vmatprep.subr.mxu1 %v2461_v35  ;;  %v3787_v24 = vld [vmem:[#allocation9_spill] sm:$0xff] }
 0x12b   :  { %610 = vmatpush1.msra.mxu0 %v2407_v26  ;;  %681 = vmatpush1.msra.mxu1 %v2473_v37  ;;  %v3788_v26 = vld [vmem:[#allocation17_spill] sm:$0xff] }
 0x12c   :  { %611 = vmatprep.subr.mxu0 %v2419_v28  ;;  %682 = vmatprep.subr.mxu1 %v2485_v39  ;;  %v3789_v28 = vld [vmem:[#allocation10_spill] sm:$0xff] }
 0x12d   :  { %612 = vmatpush1.msra.mxu0 %v2431_v30  ;;  %683 = vmatpush1.msra.mxu1 %v2497_v41  ;;  %v3790_v30 = vld [vmem:[#allocation18_spill] sm:$0xff] }
 0x12e   :  { %613 = vmatprep.subr.mxu0 %v2443_v32  ;;  %684 = vmatprep.subr.mxu1 %v2509_v43  ;;  %v3791_v32 = vld [vmem:[#allocation12_spill] sm:$0xff] }
 0x12f   :  { %614 = vmatpush1.msra.mxu0 %v2455_v34  ;;  %685 = vmatpush1.msra.mxu1 %v2521_v45  ;;  %v3792_v34 = vld [vmem:[#allocation19_spill] sm:$0xff] }
 0x130   :  { %615 = vmatprep.subr.mxu0 %v2467_v36  ;;  %686 = vmatprep.subr.mxu1 %v2533_v47  ;;  %v3793_v36 = vld [vmem:[#allocation14_spill] sm:$0xff] }
 0x131   :  { %616 = vmatpush1.msra.mxu0 %v2479_v38  ;;  %687 = vmatpush1.msra.mxu1 %v2545_v49  ;;  %v3794_v38 = vmov 0.0  }
 0x132   :  { %617 = vmatprep.subr.mxu0 %v2491_v40  ;;  %688 = vmatprep.subr.mxu1 %v2557_v51  ;;  %v3795_v40 = vld [vmem:[#allocation20_spill] sm:$0xff] }
 0x133   :  { %618 = vmatpush1.msra.mxu0 %v2503_v42  ;;  %689 = vmatpush1.msra.mxu1 %v2569_v53  ;;  %v3796_v42 = vld [vmem:[#allocation4_spill] sm:$0xff] }
 0x134   :  { %619 = vmatprep.subr.mxu0 %v2515_v44  ;;  %690 = vmatprep.subr.mxu1 %v3780_v8  ;;  %v3797_v44 = vld [vmem:[#allocation5_spill] sm:$0xff] }
 0x135   :  { %620 = vmatpush1.msra.mxu0 %v3781_v10  ;;  %691 = vmatpush1.msra.mxu1 %v3782_v12 }
 0x136   :  { %621 = vmatprep.subr.mxu0 %v3783_v15  ;;  %692 = vmatprep.subr.mxu1 %v3784_v17 }
 0x137   :  { %622 = vmatpush1.msra.mxu0 %v3785_v20  ;;  %693 = vmatpush1.msra.mxu1 %v3786_v22 }
 0x138   :  { %623 = vmatprep.subr.mxu0 %v3787_v24  ;;  %694 = vmatprep.subr.mxu1 %v3788_v26 }
 0x139   :  { %624 = vmatpush1.msra.mxu0 %v3789_v28  ;;  %695 = vmatpush1.msra.mxu1 %v3790_v30 }
 0x13a   :  { %625 = vmatprep.subr.mxu0 %v3791_v32  ;;  %696 = vmatprep.subr.mxu1 %v3792_v34 }
 0x13b   :  { %626 = vmatpush1.msra.mxu0 %v3793_v36  ;;  %659 = vmatprep.mubr.f32.mxu0 %v3794_v38 }
 0x13c   :  { %697 = vmatpush1.msra.mxu1 %v3795_v40  ;;  %730 = vmatprep.mubr.f32.mxu1 %v3794_v38 }
 0x13d   :  { %842 = vmatprep.subr.mxu0 %v3796_v42  ;;  %913 = vmatprep.subr.mxu1 %v3797_v44 }
 0x1dc   :  { %v414_v60 = vpop.f32.mrf.mxu0  ;;  %v485_v50 = vpop.f32.mrf.mxu1 }
 0x1dd   :  { %v490_v52 = vadd.f32 %v2030_v55, %v414_v60  ;;  %v492_v15 = vadd.f32 %v2032_v56, %v485_v50 }
 0x1de   :  { %v416_v62 = vpop.f32.mrf.mxu0  ;;  %v487_v57 = vpop.f32.mrf.mxu1 }
 0x1df   :  { %v2034_v63 = vmul.f32 -1.442695, %v490_v52  ;;  %v491_v9 = vadd.f32 %v2031_v48, %v416_v62  ;;  %v493_v54 = vadd.f32 %v2033_v59, %v487_v57 }
 0x1e1   :  { %2103 = vpow2.f32 %v2034_v63  ;;  %v2035_v58 = vmul.f32 -1.442695, %v491_v9  ;;  %v2036_v46 = vmul.f32 -1.442695, %v493_v54 }
 0x1e3   :  { %2105 = vpow2.f32 %v2035_v58 }
 0x1e4   :  { %2107 = vpow2.f32 %v2036_v46 }
 0x1ee   :  { %v2104_v10 = vpop.eup %2103 }
 0x1ef   :  { %v497_v20 = vadd.f32 1.0, %v2104_v10 }
 0x1f0   :  { %v2106_v24 = vpop.eup %2105 }
 0x1f1   :  { %2109 = vrcp.f32 %v497_v20  ;;  %v503_v28 = vadd.f32 1.0, %v2106_v24  ;;  %v2108_v32 = vpop.eup %2107 }
 0x1f2   :  { %2111 = vtanh.f32 %v492_v15  ;;  %v510_v55 = vadd.f32 1.0, %v2108_v32 }
 0x1f3   :  { %2113 = vrcp.f32 %v503_v28 }
 0x1f4   :  { %2115 = vrcp.f32 %v510_v55 }
 0x1fe   :  { %v2110_v36 = vpop.eup %2109 }
 0x1ff   :  { %v2112_v42 = vpop.eup %2111 }
 0x200   :  { %v2114_v44 = vpop.eup %2113  ;;  %v514_v48 = vmul.f32 %v2112_v42, %v2110_v36 }
 0x201   :  { %v513_v60 = vmul.f32 %v2114_v44, %v2739_v61  ;;  %v2116_v63 = vpop.eup %2115 }
 0x203   :  { %v515_v52 = vadd.f32 %v514_v48, %v513_v60 }
 0x205   :  { %2117 = vtanh.f32 %v515_v52  ;;  %v2830_v62 = vsel %vm520_vm1, %v515_v52, %v2739_v61 }
 0x212   :  { %v2118_v9 = vpop.eup %2117 }
 0x213   :  { %v517_v50 = vmul.f32 %v2118_v9, %v2116_v63 }
 0x215   :  { %v2833_v58 = vsel %vm520_vm1, %v517_v50, %v2742_v3  ;;  %v523_v59 = vsel %vm520_vm1, %v517_v50, 0.0  ;;  %v3064_v50 = vld [vmem:[%s3684_s4 + $0x1f8] sm:$0xff] }
 0x216   :  { %2037 = vst [vmem:[%s3689_s5 + $0x8] sm:$0xff] %v523_v59  ;;  %660 = vmatmul.mubr.f32.vlgmr.msra.gmra.mxu0 %v2833_v58  ;;  %731 = vmatmul.mubr.f32.vlgmr.msra.gmra.mxu1 %v2833_v58  ;;  %3807 = vst [vmem:[#allocation10_spill] sm:$0xff] %v3064_v50  ;;  %v3076_v59 = vld [vmem:[%s3684_s4 + $0x1f0] sm:$0xff] }
 0x217   :  { %843 = vmatpush1.msra.mxu0 %v2265_v1  ;;  %914 = vmatpush1.msra.mxu1 %v2319_v11  ;;  %v2882_v1 = vld [vmem:[%s3684_s4 + $0x180] sm:$0xff] }
 0x218   :  { %844 = vmatprep.subr.mxu0 %v2270_v2  ;;  %915 = vmatprep.subr.mxu1 %v2331_v13  ;;  %v2887_v2 = vld [vmem:[%s3684_s4 + $0x168] sm:$0xff]  ;;  %v2916_v11 = vld [vmem:[%s3684_s4 + $0x120] sm:$0xff] }
 0x219   :  { %845 = vmatpush1.msra.mxu0 %v2278_v4  ;;  %916 = vmatpush1.msra.mxu1 %v2336_v14  ;;  %v2892_v4 = vld [vmem:[%s3684_s4 + $0x160] sm:$0xff]  ;;  %v2922_v13 = vld [vmem:[%s3684_s4 + $0x108] sm:$0xff] }
 0x21a   :  { %846 = vmatprep.subr.mxu0 %v2284_v5  ;;  %917 = vmatprep.subr.mxu1 %v2348_v16  ;;  %v2898_v5 = vld [vmem:[%s3684_s4 + $0x148] sm:$0xff]  ;;  %v2928_v14 = vld [vmem:[%s3684_s4 + $0x100] sm:$0xff] }
 0x21b   :  { %847 = vmatpush1.msra.mxu0 %v2290_v6  ;;  %918 = vmatpush1.msra.mxu1 %v2360_v18  ;;  %v2904_v6 = vld [vmem:[%s3684_s4 + $0x140] sm:$0xff]  ;;  %v2934_v16 = vld [vmem:[%s3684_s4 + $0xe8] sm:$0xff] }
 0x21c   :  { %848 = vmatprep.subr.mxu0 %v2296_v7  ;;  %919 = vmatprep.subr.mxu1 %v2365_v19  ;;  %v2910_v7 = vld [vmem:[%s3684_s4 + $0x128] sm:$0xff]  ;;  %v2940_v18 = vld [vmem:[%s3684_s4 + $0xe0] sm:$0xff] }
 0x21d   :  { %920 = vmatpush1.msra.mxu1 %v2377_v21  ;;  %906 = vmatprep.mubr.f32.mxu0 %v3794_v38  ;;  %v2946_v19 = vld [vmem:[%s3684_s4 + $0xc8] sm:$0xff]  ;;  %v2952_v21 = vld [vmem:[%s3684_s4 + $0xc0] sm:$0xff] }
 0x21e   :  { %921 = vmatprep.subr.mxu1 %v2389_v23  ;;  %977 = vmatprep.mubr.f32.mxu1 %v3794_v38  ;;  %v2958_v23 = vld [vmem:[%s3684_s4 + $0xa8] sm:$0xff] }
 0x21f   :  { %922 = vmatpush1.msra.mxu1 %v2401_v25  ;;  %849 = vmatpush1.msra.mxu0 %v2882_v1  ;;  %v2964_v25 = vld [vmem:[%s3684_s4 + $0xa0] sm:$0xff] }
 0x220   :  { %923 = vmatprep.subr.mxu1 %v2413_v27  ;;  %850 = vmatprep.subr.mxu0 %v2887_v2  ;;  %v2970_v27 = vld [vmem:[%s3684_s4 + $0x88] sm:$0xff] }
 0x221   :  { %924 = vmatpush1.msra.mxu1 %v2425_v29  ;;  %851 = vmatpush1.msra.mxu0 %v2892_v4  ;;  %v2976_v29 = vld [vmem:[%s3684_s4 + $0x80] sm:$0xff] }
 0x222   :  { %925 = vmatprep.subr.mxu1 %v2437_v31  ;;  %852 = vmatprep.subr.mxu0 %v2898_v5  ;;  %v2982_v31 = vld [vmem:[%s3684_s4 + $0x68] sm:$0xff] }
 0x223   :  { %926 = vmatpush1.msra.mxu1 %v2449_v33  ;;  %853 = vmatpush1.msra.mxu0 %v2904_v6  ;;  %3798 = vst [vmem:[#allocation11_spill] sm:$0xff] %v2982_v31  ;;  %v2988_v33 = vld [vmem:[%s3684_s4 + $0x60] sm:$0xff] }
 0x224   :  { %927 = vmatprep.subr.mxu1 %v2461_v35  ;;  %854 = vmatprep.subr.mxu0 %v2910_v7  ;;  %3799 = vst [vmem:[#allocation6_spill] sm:$0xff] %v2988_v33  ;;  %v2994_v35 = vld [vmem:[%s3684_s4 + $0x48] sm:$0xff] }
 0x225   :  { %928 = vmatpush1.msra.mxu1 %v2473_v37  ;;  %855 = vmatpush1.msra.mxu0 %v2916_v11  ;;  %3800 = vst [vmem:[#allocation13_spill] sm:$0xff] %v2994_v35  ;;  %v3000_v37 = vld [vmem:[%s3684_s4 + $0x40] sm:$0xff] }
 0x226   :  { %929 = vmatprep.subr.mxu1 %v2485_v39  ;;  %856 = vmatprep.subr.mxu0 %v2922_v13  ;;  %3801 = vst [vmem:[#allocation7_spill] sm:$0xff] %v3000_v37  ;;  %v3006_v39 = vld [vmem:[%s3684_s4 + $0x28] sm:$0xff] }
 0x227   :  { %930 = vmatpush1.msra.mxu1 %v2497_v41  ;;  %857 = vmatpush1.msra.mxu0 %v2928_v14  ;;  %3802 = vst [vmem:[#allocation15_spill] sm:$0xff] %v3006_v39  ;;  %v3012_v41 = vld [vmem:[%s3684_s4 + $0x20] sm:$0xff] }
 0x228   :  { %931 = vmatprep.subr.mxu1 %v2509_v43  ;;  %858 = vmatprep.subr.mxu0 %v2934_v16  ;;  %3803 = vst [vmem:[#allocation8_spill] sm:$0xff] %v3012_v41  ;;  %v3018_v43 = vld [vmem:[%s3684_s4 + $0x8] sm:$0xff] }
 0x229   :  { %932 = vmatpush1.msra.mxu1 %v2521_v45  ;;  %859 = vmatpush1.msra.mxu0 %v2940_v18  ;;  %3804 = vst [vmem:[#allocation16_spill] sm:$0xff] %v3018_v43  ;;  %v3024_v45 = vld [vmem:[%s3684_s4] sm:$0xff] }
 0x22a   :  { %933 = vmatprep.subr.mxu1 %v2533_v47  ;;  %860 = vmatprep.subr.mxu0 %v2946_v19  ;;  %3805 = vst [vmem:[#allocation9_spill] sm:$0xff] %v3024_v45  ;;  %v2038_v47 = vld [vmem:[%s3686_s0 + $0x40] sm:$0xff] }
 0x22b   :  { %934 = vmatpush1.msra.mxu1 %v2545_v49  ;;  %861 = vmatpush1.msra.mxu0 %v2952_v21 }
 0x22c   :  { %935 = vmatprep.subr.mxu1 %v2557_v51  ;;  %862 = vmatprep.subr.mxu0 %v2958_v23  ;;  %v2039_v51 = vld [vmem:[%s3686_s0 + $0x48] sm:$0xff] }
 0x22d   :  { %936 = vmatpush1.msra.mxu1 %v2569_v53  ;;  %863 = vmatpush1.msra.mxu0 %v2964_v25 }
 0x22e   :  { %937 = vmatprep.subr.mxu1 %v3780_v8  ;;  %864 = vmatprep.subr.mxu0 %v2970_v27 }
 0x22f   :  { %938 = vmatpush1.msra.mxu1 %v3782_v12  ;;  %865 = vmatpush1.msra.mxu0 %v2976_v29 }
 0x230   :  { %939 = vmatprep.subr.mxu1 %v3784_v17  ;;  %866 = vmatprep.subr.mxu0 %v2982_v31 }
 0x231   :  { %940 = vmatpush1.msra.mxu1 %v3786_v22  ;;  %867 = vmatpush1.msra.mxu0 %v2988_v33  ;;  %v2041_v22 = vld [vmem:[%s3686_s0 + $0x58] sm:$0xff] }
 0x232   :  { %941 = vmatprep.subr.mxu1 %v3788_v26  ;;  %868 = vmatprep.subr.mxu0 %v2994_v35 }
 0x233   :  { %942 = vmatpush1.msra.mxu1 %v3790_v30  ;;  %869 = vmatpush1.msra.mxu0 %v3000_v37 }
 0x234   :  { %943 = vmatprep.subr.mxu1 %v3792_v34  ;;  %870 = vmatprep.subr.mxu0 %v3006_v39  ;;  %v2040_v34 = vld [vmem:[%s3686_s0 + $0x50] sm:$0xff] }
 0x235   :  { %944 = vmatpush1.msra.mxu1 %v3795_v40  ;;  %871 = vmatpush1.msra.mxu0 %v3012_v41 }
 0x236   :  { %872 = vmatprep.subr.mxu0 %v3018_v43  ;;  %1160 = vmatprep.subr.mxu1 %v3064_v50 }
 0x237   :  { %873 = vmatpush1.msra.mxu0 %v3024_v45 }
 0x2d6   :  { %v661_v49 = vpop.f32.mrf.mxu0  ;;  %v732_v12 = vpop.f32.mrf.mxu1 }
 0x2d7   :  { %v737_v53 = vadd.f32 %v2038_v47, %v661_v49  ;;  %v739_v54 = vadd.f32 %v2040_v34, %v732_v12  ;;  %v3081_v47 = vld [vmem:[%s3684_s4 + $0x1c8] sm:$0xff]  ;;  %v3086_v49 = vld [vmem:[%s3684_s4 + $0x1d8] sm:$0xff]  ;;  %v3120_v12 = vld [vmem:[%s3684_s4 + $0x1b0] sm:$0xff] }
 0x2d8   :  { %v663_v61 = vpop.f32.mrf.mxu0  ;;  %v734_v26 = vpop.f32.mrf.mxu1  ;;  %v3153_v34 = vld [vmem:[%s3684_s4 + $0x170] sm:$0xff] }
 0x2d9   :  { %v2042_v3 = vmul.f32 -1.442695, %v737_v53  ;;  %v738_v8 = vadd.f32 %v2039_v51, %v663_v61  ;;  %v740_v30 = vadd.f32 %v2041_v22, %v734_v26  ;;  %v3093_v51 = vld [vmem:[%s3684_s4 + $0x1c0] sm:$0xff]  ;;  %v3098_v53 = vld [vmem:[%s3684_s4 + $0x1d0] sm:$0xff]  ;;  %v3103_v61 = vld [vmem:[%s3684_s4 + $0x1a8] sm:$0xff] }
 0x2da   :  { %v3132_v22 = vld [vmem:[%s3684_s4 + $0x198] sm:$0xff]  ;;  %v3139_v26 = vld [vmem:[%s3684_s4 + $0x190] sm:$0xff] }
 0x2db   :  { %2119 = vpow2.f32 %v2042_v3  ;;  %v2043_v17 = vmul.f32 -1.442695, %v738_v8  ;;  %v2044_v40 = vmul.f32 -1.442695, %v740_v30  ;;  %v3110_v3 = vld [vmem:[%s3684_s4 + $0x1b8] sm:$0xff]  ;;  %v3115_v8 = vld [vmem:[%s3684_s4 + $0x1a0] sm:$0xff] }
 0x2dc   :  { %v3146_v30 = vld [vmem:[%s3684_s4 + $0x178] sm:$0xff] }
 0x2dd   :  { %2121 = vpow2.f32 %v2043_v17  ;;  %v3127_v17 = vld [vmem:[%s3684_s4 + $0x188] sm:$0xff] }
 0x2de   :  { %2123 = vpow2.f32 %v2044_v40  ;;  %v3160_v40 = vld [vmem:[%s3684_s4 + $0x158] sm:$0xff] }
 0x2e8   :  { %v2120_v57 = vpop.eup %2119 }
 0x2e9   :  { %v744_v56 = vadd.f32 1.0, %v2120_v57  ;;  %v3167_v57 = vld [vmem:[%s3684_s4 + $0x150] sm:$0xff] }
 0x2ea   :  { %v2122_v46 = vpop.eup %2121 }
 0x2eb   :  { %2125 = vrcp.f32 %v744_v56  ;;  %v750_v10 = vadd.f32 1.0, %v2122_v46  ;;  %v2124_v15 = vpop.eup %2123  ;;  %v3181_v56 = vld [vmem:[%s3684_s4 + $0x130] sm:$0xff]  ;;  %v3188_v46 = vld [vmem:[%s3684_s4 + $0x118] sm:$0xff] }
 0x2ec   :  { %2127 = vtanh.f32 %v739_v54  ;;  %v757_v32 = vadd.f32 1.0, %v2124_v15  ;;  %v3174_v54 = vld [vmem:[%s3684_s4 + $0x138] sm:$0xff] }
 0x2ed   :  { %2129 = vrcp.f32 %v750_v10  ;;  %v3195_v10 = vld [vmem:[%s3684_s4 + $0x110] sm:$0xff]  ;;  %v3202_v15 = vld [vmem:[%s3684_s4 + $0xf8] sm:$0xff] }
 0x2ee   :  { %2131 = vrcp.f32 %v757_v32  ;;  %v3230_v32 = vld [vmem:[%s3684_s4 + $0xb8] sm:$0xff] }
 0x2f8   :  { %v2126_v20 = vpop.eup %2125 }
 0x2f9   :  { %v2128_v24 = vpop.eup %2127 }
 0x2fa   :  { %v2130_v28 = vpop.eup %2129  ;;  %v761_v42 = vmul.f32 %v2128_v24, %v2126_v20  ;;  %v3209_v20 = vld [vmem:[%s3684_s4 + $0xf0] sm:$0xff]  ;;  %v3216_v24 = vld [vmem:[%s3684_s4 + $0xd8] sm:$0xff] }
 0x2fb   :  { %v760_v36 = vmul.f32 %v2130_v28, %v2830_v62  ;;  %v2132_v60 = vpop.eup %2131  ;;  %v3223_v28 = vld [vmem:[%s3684_s4 + $0xd0] sm:$0xff] }
 0x2fd   :  { %v762_v44 = vadd.f32 %v761_v42, %v760_v36  ;;  %v3237_v36 = vld [vmem:[%s3684_s4 + $0xb0] sm:$0xff]  ;;  %v3244_v42 = vld [vmem:[%s3684_s4 + $0x98] sm:$0xff] }
 0x2ff   :  { %2133 = vtanh.f32 %v762_v44  ;;  %v3044_v55 = vsel %vm767_vm2, %v762_v44, %v2830_v62  ;;  %v3059_v62 = vld [vmem:[%s3684_s4 + $0x1e8] sm:$0xff]  ;;  %v3251_v44 = vld [vmem:[%s3684_s4 + $0x90] sm:$0xff] }
 0x300   :  { %3806 = vst [vmem:[#allocation17_spill] sm:$0xff] %v3059_v62  ;;  %1089 = vmatprep.subr.mxu0 %v3059_v62  ;;  %3808 = vst [vmem:[#allocation18_spill] sm:$0xff] %v3251_v44 }
 0x307   :  { %v3817_v0 = vld [vmem:[#allocation18_spill] sm:$0xff] }
 0x30c   :  { %v2134_v48 = vpop.eup %2133 }
 0x30d   :  { %v764_v52 = vmul.f32 %v2134_v48, %v2132_v60  ;;  %v3258_v60 = vld [vmem:[%s3684_s4 + $0x78] sm:$0xff]  ;;  %v3265_v48 = vld [vmem:[%s3684_s4 + $0x70] sm:$0xff] }
 0x30e   :  { %3809 = vst [vmem:[#allocation12_spill] sm:$0xff] %v3258_v60  ;;  %3810 = vst [vmem:[#allocation19_spill] sm:$0xff] %v3265_v48 }
 0x30f   :  { %v3047_v63 = vsel %vm767_vm2, %v764_v52, %v2833_v58  ;;  %v770_v9 = vsel %vm767_vm2, %v764_v52, 0.0  ;;  %v3069_v58 = vld [vmem:[%s3684_s4 + $0x1e0] sm:$0xff]  ;;  %v3272_v52 = vld [vmem:[%s3684_s4 + $0x58] sm:$0xff] }
 0x310   :  { %2045 = vst [vmem:[%s3689_s5 + $0x10] sm:$0xff] %v770_v9  ;;  %907 = vmatmul.mubr.f32.vlgmr.msra.gmra.mxu0 %v3047_v63  ;;  %978 = vmatmul.mubr.f32.vlgmr.msra.gmra.mxu1 %v3047_v63  ;;  %3811 = vst [vmem:[#allocation14_spill] sm:$0xff] %v3272_v52  ;;  %v3279_v9 = vld [vmem:[%s3684_s4 + $0x50] sm:$0xff] }
 0x311   :  { %1153 = vmatprep.mubr.f32.mxu0 %v3794_v38  ;;  %1224 = vmatprep.mubr.f32.mxu1 %v3794_v38  ;;  %3812 = vst [vmem:[#allocation20_spill] sm:$0xff] %v3279_v9  ;;  %v3286_v38 = vld [vmem:[%s3684_s4 + $0x38] sm:$0xff] }
 0x312   :  { %1090 = vmatpush1.msra.mxu0 %v3069_v58  ;;  %1161 = vmatpush1.msra.mxu1 %v3076_v59  ;;  %3813 = vst [vmem:[#allocation4_spill] sm:$0xff] %v3286_v38 }
 0x313   :  { %1091 = vmatprep.subr.mxu0 %v3081_v47  ;;  %1162 = vmatprep.subr.mxu1 %v3086_v49 }
 0x314   :  { %1092 = vmatpush1.msra.mxu0 %v3093_v51  ;;  %1163 = vmatpush1.msra.mxu1 %v3098_v53 }
 0x315   :  { %1093 = vmatprep.subr.mxu0 %v3103_v61  ;;  %1164 = vmatprep.subr.mxu1 %v3110_v3 }
 0x316   :  { %1094 = vmatpush1.msra.mxu0 %v3115_v8  ;;  %1165 = vmatpush1.msra.mxu1 %v3120_v12 }
 0x317   :  { %1095 = vmatprep.subr.mxu0 %v3127_v17  ;;  %1166 = vmatprep.subr.mxu1 %v3132_v22 }
 0x318   :  { %1096 = vmatpush1.msra.mxu0 %v2882_v1  ;;  %1167 = vmatpush1.msra.mxu1 %v3139_v26 }
 0x319   :  { %1097 = vmatprep.subr.mxu0 %v2887_v2  ;;  %1168 = vmatprep.subr.mxu1 %v3146_v30 }
 0x31a   :  { %1098 = vmatpush1.msra.mxu0 %v2892_v4  ;;  %1169 = vmatpush1.msra.mxu1 %v3153_v34 }
 0x31b   :  { %1099 = vmatprep.subr.mxu0 %v2898_v5  ;;  %1170 = vmatprep.subr.mxu1 %v3160_v40 }
 0x31c   :  { %1100 = vmatpush1.msra.mxu0 %v2904_v6  ;;  %1171 = vmatpush1.msra.mxu1 %v3167_v57 }
 0x31d   :  { %1101 = vmatprep.subr.mxu0 %v2910_v7  ;;  %1172 = vmatprep.subr.mxu1 %v3174_v54 }
 0x31e   :  { %1102 = vmatpush1.msra.mxu0 %v2916_v11  ;;  %1173 = vmatpush1.msra.mxu1 %v3181_v56 }
 0x31f   :  { %1103 = vmatprep.subr.mxu0 %v2922_v13  ;;  %1174 = vmatprep.subr.mxu1 %v3188_v46 }
 0x320   :  { %1104 = vmatpush1.msra.mxu0 %v2928_v14  ;;  %1175 = vmatpush1.msra.mxu1 %v3195_v10 }
 0x321   :  { %1105 = vmatprep.subr.mxu0 %v2934_v16  ;;  %1176 = vmatprep.subr.mxu1 %v3202_v15 }
 0x322   :  { %1106 = vmatpush1.msra.mxu0 %v2940_v18  ;;  %1177 = vmatpush1.msra.mxu1 %v3209_v20 }
 0x323   :  { %1107 = vmatprep.subr.mxu0 %v2946_v19  ;;  %1178 = vmatprep.subr.mxu1 %v3216_v24 }
 0x324   :  { %1108 = vmatpush1.msra.mxu0 %v2952_v21  ;;  %1179 = vmatpush1.msra.mxu1 %v3223_v28 }
 0x325   :  { %1109 = vmatprep.subr.mxu0 %v2958_v23  ;;  %1180 = vmatprep.subr.mxu1 %v3230_v32 }
 0x326   :  { %1110 = vmatpush1.msra.mxu0 %v2964_v25  ;;  %1181 = vmatpush1.msra.mxu1 %v3237_v36 }
 0x327   :  { %1111 = vmatprep.subr.mxu0 %v2970_v27  ;;  %1182 = vmatprep.subr.mxu1 %v3244_v42 }
 0x328   :  { %1112 = vmatpush1.msra.mxu0 %v2976_v29  ;;  %1183 = vmatpush1.msra.mxu1 %v3251_v44 }
 0x329   :  { %1113 = vmatprep.subr.mxu0 %v2982_v31  ;;  %1184 = vmatprep.subr.mxu1 %v3258_v60  ;;  %v3293_v60 = vld [vmem:[%s3684_s4 + $0x30] sm:$0xff] }
 0x32a   :  { %1114 = vmatpush1.msra.mxu0 %v2988_v33  ;;  %1185 = vmatpush1.msra.mxu1 %v3265_v48  ;;  %3814 = vst [vmem:[#allocation5_spill] sm:$0xff] %v3293_v60  ;;  %v3300_v48 = vld [vmem:[%s3684_s4 + $0x18] sm:$0xff] }
 0x32b   :  { %1115 = vmatprep.subr.mxu0 %v2994_v35  ;;  %1186 = vmatprep.subr.mxu1 %v3272_v52  ;;  %3815 = vst [vmem:[#allocation21_spill] sm:$0xff] %v3300_v48  ;;  %v3307_v52 = vld [vmem:[%s3684_s4 + $0x10] sm:$0xff] }
 0x32c   :  { %1116 = vmatpush1.msra.mxu0 %v3000_v37  ;;  %1187 = vmatpush1.msra.mxu1 %v3279_v9  ;;  %3816 = vst [vmem:[#allocation22_spill] sm:$0xff] %v3307_v52  ;;  %v2048_v35 = vld [vmem:[%s3686_s0 + $0x70] sm:$0xff] }
 0x32d   :  { %1117 = vmatprep.subr.mxu0 %v3006_v39  ;;  %1188 = vmatprep.subr.mxu1 %v3286_v38  ;;  %v2046_v38 = vld [vmem:[%s3686_s0 + $0x60] sm:$0xff] }
 0x32e   :  { %1118 = vmatpush1.msra.mxu0 %v3012_v41  ;;  %1189 = vmatpush1.msra.mxu1 %v3293_v60  ;;  %v2047_v60 = vld [vmem:[%s3686_s0 + $0x68] sm:$0xff] }
 0x32f   :  { %1119 = vmatprep.subr.mxu0 %v3018_v43  ;;  %1190 = vmatprep.subr.mxu1 %v3300_v48 }
 0x330   :  { %1120 = vmatpush1.msra.mxu0 %v3024_v45  ;;  %1191 = vmatpush1.msra.mxu1 %v3307_v52 }
 0x331   :  { %1336 = vmatprep.subr.mxu0 %v3059_v62  ;;  %1407 = vmatprep.subr.mxu1 %v3064_v50  ;;  %v2049_v50 = vld [vmem:[%s3686_s0 + $0x78] sm:$0xff] }
 0x3d0   :  { %v908_v39 = vpop.f32.mrf.mxu0  ;;  %v979_v45 = vpop.f32.mrf.mxu1 }
 0x3d1   :  { %v984_v43 = vadd.f32 %v2046_v38, %v908_v39  ;;  %v986_v38 = vadd.f32 %v2048_v35, %v979_v45 }
 0x3d2   :  { %v910_v41 = vpop.f32.mrf.mxu0  ;;  %v981_v62 = vpop.f32.mrf.mxu1 }
 0x3d3   :  { %v2050_v48 = vmul.f32 -1.442695, %v984_v43  ;;  %v985_v9 = vadd.f32 %v2047_v60, %v910_v41  ;;  %v987_v37 = vadd.f32 %v2049_v50, %v981_v62 }
 0x3d5   :  { %2135 = vpow2.f32 %v2050_v48  ;;  %v2051_v52 = vmul.f32 -1.442695, %v985_v9  ;;  %v2052_v33 = vmul.f32 -1.442695, %v987_v37 }
 0x3d7   :  { %2137 = vpow2.f32 %v2051_v52 }
 0x3d8   :  { %2139 = vpow2.f32 %v2052_v33 }
 0x3e2   :  { %v2136_v31 = vpop.eup %2135 }
 0x3e3   :  { %v991_v39 = vadd.f32 1.0, %v2136_v31 }
 0x3e4   :  { %v2138_v43 = vpop.eup %2137 }
 0x3e5   :  { %2141 = vrcp.f32 %v991_v39  ;;  %v997_v41 = vadd.f32 1.0, %v2138_v43  ;;  %v2140_v60 = vpop.eup %2139  ;;  %v3821_v43 = vld [vmem:[#allocation19_spill] sm:$0xff] }
 0x3e6   :  { %2143 = vtanh.f32 %v986_v38  ;;  %v1004_v44 = vadd.f32 1.0, %v2140_v60  ;;  %v3823_v60 = vld [vmem:[#allocation14_spill] sm:$0xff] }
 0x3e7   :  { %2145 = vrcp.f32 %v997_v41  ;;  %v3822_v41 = vld [vmem:[#allocation13_spill] sm:$0xff] }
 0x3e8   :  { %2147 = vrcp.f32 %v1004_v44  ;;  %v3820_v44 = vld [vmem:[#allocation6_spill] sm:$0xff] }
 0x3f2   :  { %v2142_v48 = vpop.eup %2141 }
 0x3f3   :  { %v2144_v52 = vpop.eup %2143 }
 0x3f4   :  { %v2146_v9 = vpop.eup %2145  ;;  %v1008_v50 = vmul.f32 %v2144_v52, %v2142_v48  ;;  %v3824_v48 = vld [vmem:[#allocation7_spill] sm:$0xff]  ;;  %v3825_v52 = vld [vmem:[#allocation20_spill] sm:$0xff] }
 0x3f5   :  { %v1007_v62 = vmul.f32 %v2146_v9, %v3044_v55  ;;  %v2148_v33 = vpop.eup %2147  ;;  %v3826_v9 = vld [vmem:[#allocation15_spill] sm:$0xff] }
 0x3f7   :  { %v1009_v37 = vadd.f32 %v1008_v50, %v1007_v62  ;;  %v3827_v62 = vld [vmem:[#allocation4_spill] sm:$0xff] }
 0x3f8   :  { %v3828_v50 = vld [vmem:[#allocation8_spill] sm:$0xff] }
 0x3f9   :  { %2149 = vtanh.f32 %v1009_v37  ;;  %v3332_v31 = vsel %vm1014_vm3, %v1009_v37, %v3044_v55  ;;  %v3818_v55 = vld [vmem:[#allocation11_spill] sm:$0xff]  ;;  %v3829_v37 = vld [vmem:[#allocation5_spill] sm:$0xff] }
 0x406   :  { %v2150_v35 = vpop.eup %2149 }
 0x407   :  { %v1011_v45 = vmul.f32 %v2150_v35, %v2148_v33  ;;  %v3830_v33 = vld [vmem:[#allocation16_spill] sm:$0xff]  ;;  %v3831_v35 = vld [vmem:[#allocation21_spill] sm:$0xff] }
 0x409   :  { %v3335_v38 = vsel %vm1014_vm3, %v1011_v45, %v3047_v63  ;;  %v1017_v39 = vsel %vm1014_vm3, %v1011_v45, 0.0  ;;  %v3819_v63 = vld [vmem:[#allocation12_spill] sm:$0xff]  ;;  %v3832_v45 = vld [vmem:[#allocation9_spill] sm:$0xff] }
 0x40a   :  { %2053 = vst [vmem:[%s3689_s5 + $0x18] sm:$0xff] %v1017_v39  ;;  %1154 = vmatmul.mubr.f32.vlgmr.msra.gmra.mxu0 %v3335_v38  ;;  %1225 = vmatmul.mubr.f32.vlgmr.msra.gmra.mxu1 %v3335_v38  ;;  %v3833_v39 = vmov 0.0  }
 0x40b   :  { %1337 = vmatpush1.msra.mxu0 %v3069_v58  ;;  %1408 = vmatpush1.msra.mxu1 %v3076_v59 }
 0x40c   :  { %1338 = vmatprep.subr.mxu0 %v3081_v47  ;;  %1409 = vmatprep.subr.mxu1 %v3086_v49 }
 0x40d   :  { %1339 = vmatpush1.msra.mxu0 %v3093_v51  ;;  %1410 = vmatpush1.msra.mxu1 %v3098_v53 }
 0x40e   :  { %1340 = vmatprep.subr.mxu0 %v3103_v61  ;;  %1411 = vmatprep.subr.mxu1 %v3110_v3 }
 0x40f   :  { %1341 = vmatpush1.msra.mxu0 %v3115_v8  ;;  %1412 = vmatpush1.msra.mxu1 %v3120_v12 }
 0x410   :  { %1342 = vmatprep.subr.mxu0 %v3127_v17  ;;  %1413 = vmatprep.subr.mxu1 %v3132_v22 }
 0x411   :  { %1343 = vmatpush1.msra.mxu0 %v2882_v1  ;;  %1414 = vmatpush1.msra.mxu1 %v3139_v26 }
 0x412   :  { %1344 = vmatprep.subr.mxu0 %v2887_v2  ;;  %1415 = vmatprep.subr.mxu1 %v3146_v30 }
 0x413   :  { %1345 = vmatpush1.msra.mxu0 %v2892_v4  ;;  %1416 = vmatpush1.msra.mxu1 %v3153_v34 }
 0x414   :  { %1346 = vmatprep.subr.mxu0 %v2898_v5  ;;  %1417 = vmatprep.subr.mxu1 %v3160_v40 }
 0x415   :  { %1347 = vmatpush1.msra.mxu0 %v2904_v6  ;;  %1418 = vmatpush1.msra.mxu1 %v3167_v57 }
 0x416   :  { %1348 = vmatprep.subr.mxu0 %v2910_v7  ;;  %1419 = vmatprep.subr.mxu1 %v3174_v54 }
 0x417   :  { %1349 = vmatpush1.msra.mxu0 %v2916_v11  ;;  %1420 = vmatpush1.msra.mxu1 %v3181_v56 }
 0x418   :  { %1350 = vmatprep.subr.mxu0 %v2922_v13  ;;  %1421 = vmatprep.subr.mxu1 %v3188_v46 }
 0x419   :  { %1351 = vmatpush1.msra.mxu0 %v2928_v14  ;;  %1422 = vmatpush1.msra.mxu1 %v3195_v10 }
 0x41a   :  { %1352 = vmatprep.subr.mxu0 %v2934_v16  ;;  %1423 = vmatprep.subr.mxu1 %v3202_v15 }
 0x41b   :  { %1353 = vmatpush1.msra.mxu0 %v2940_v18  ;;  %1424 = vmatpush1.msra.mxu1 %v3209_v20 }
 0x41c   :  { %1354 = vmatprep.subr.mxu0 %v2946_v19  ;;  %1425 = vmatprep.subr.mxu1 %v3216_v24 }
 0x41d   :  { %1355 = vmatpush1.msra.mxu0 %v2952_v21  ;;  %1426 = vmatpush1.msra.mxu1 %v3223_v28 }
 0x41e   :  { %1356 = vmatprep.subr.mxu0 %v2958_v23  ;;  %1427 = vmatprep.subr.mxu1 %v3230_v32 }
 0x41f   :  { %1357 = vmatpush1.msra.mxu0 %v2964_v25  ;;  %1428 = vmatpush1.msra.mxu1 %v3237_v36 }
 0x420   :  { %1358 = vmatprep.subr.mxu0 %v2970_v27  ;;  %1429 = vmatprep.subr.mxu1 %v3244_v42 }
 0x421   :  { %1359 = vmatpush1.msra.mxu0 %v2976_v29  ;;  %1430 = vmatpush1.msra.mxu1 %v3817_v0 }
 0x422   :  { %1360 = vmatprep.subr.mxu0 %v3818_v55  ;;  %1431 = vmatprep.subr.mxu1 %v3819_v63 }
 0x423   :  { %1361 = vmatpush1.msra.mxu0 %v3820_v44  ;;  %1432 = vmatpush1.msra.mxu1 %v3821_v43  ;;  %v2056_v43 = vld [vmem:[%s3686_s0 + $0x90] sm:$0xff] }
 0x424   :  { %1362 = vmatprep.subr.mxu0 %v3822_v41  ;;  %1433 = vmatprep.subr.mxu1 %v3823_v60  ;;  %v3834_v60 = vld [vmem:[#allocation22_spill] sm:$0xff] }
 0x425   :  { %1363 = vmatpush1.msra.mxu0 %v3824_v48  ;;  %1434 = vmatpush1.msra.mxu1 %v3825_v52  ;;  %v3835_v52 = vld [vmem:[#allocation17_spill] sm:$0xff] }
 0x426   :  { %1364 = vmatprep.subr.mxu0 %v3826_v9  ;;  %1435 = vmatprep.subr.mxu1 %v3827_v62  ;;  %v3836_v9 = vld [vmem:[#allocation10_spill] sm:$0xff] }
 0x427   :  { %1365 = vmatpush1.msra.mxu0 %v3828_v50  ;;  %1436 = vmatpush1.msra.mxu1 %v3829_v37  ;;  %v2054_v37 = vld [vmem:[%s3686_s0 + $0x80] sm:$0xff] }
 0x428   :  { %1366 = vmatprep.subr.mxu0 %v3830_v33  ;;  %1437 = vmatprep.subr.mxu1 %v3831_v35  ;;  %v2055_v35 = vld [vmem:[%s3686_s0 + $0x88] sm:$0xff] }
 0x429   :  { %1367 = vmatpush1.msra.mxu0 %v3832_v45  ;;  %1400 = vmatprep.mubr.f32.mxu0 %v3833_v39 }
 0x42a   :  { %1438 = vmatpush1.msra.mxu1 %v3834_v60  ;;  %1471 = vmatprep.mubr.f32.mxu1 %v3833_v39 }
 0x42b   :  { %1583 = vmatprep.subr.mxu0 %v3835_v52  ;;  %1654 = vmatprep.subr.mxu1 %v3836_v9  ;;  %v2057_v9 = vld [vmem:[%s3686_s0 + $0x98] sm:$0xff] }
 0x4ca   :  { %v1155_v50 = vpop.f32.mrf.mxu0  ;;  %v1226_v60 = vpop.f32.mrf.mxu1 }
 0x4cb   :  { %v1231_v45 = vadd.f32 %v2054_v37, %v1155_v50  ;;  %v1233_v50 = vadd.f32 %v2056_v43, %v1226_v60 }
 0x4cc   :  { %v1157_v33 = vpop.f32.mrf.mxu0  ;;  %v1228_v52 = vpop.f32.mrf.mxu1 }
 0x4cd   :  { %v2058_v62 = vmul.f32 -1.442695, %v1231_v45  ;;  %v1232_v48 = vadd.f32 %v2055_v35, %v1157_v33  ;;  %v1234_v41 = vadd.f32 %v2057_v9, %v1228_v52 }
 0x4cf   :  { %2151 = vpow2.f32 %v2058_v62  ;;  %v2059_v39 = vmul.f32 -1.442695, %v1232_v48  ;;  %v2060_v44 = vmul.f32 -1.442695, %v1234_v41  ;;  %v3424_v41 = vld [vmem:[%s3688_s3] sm:$0xff] }
 0x4d0   :  { %vm1261_vm4 = vcmp.gt.s32.totalorder %v3424_v41, 4  ;;  %vm1508_vm5 = vcmp.gt.s32.totalorder %v3424_v41, 5  ;;  %vm1755_vm6 = vcmp.gt.s32.totalorder %v3424_v41, 6  ;;  %vm2002_vm7 = vcmp.gt.s32.totalorder %v3424_v41, 7 }
 0x4d1   :  { %2153 = vpow2.f32 %v2059_v39 }
 0x4d2   :  { %2155 = vpow2.f32 %v2060_v44 }
 0x4dc   :  { %v2152_v63 = vpop.eup %2151 }
 0x4dd   :  { %v1238_v37 = vadd.f32 1.0, %v2152_v63 }
 0x4de   :  { %v2154_v45 = vpop.eup %2153 }
 0x4df   :  { %2157 = vrcp.f32 %v1238_v37  ;;  %v1244_v62 = vadd.f32 1.0, %v2154_v45  ;;  %v2156_v48 = vpop.eup %2155 }
 0x4e0   :  { %2159 = vtanh.f32 %v1233_v50  ;;  %v1251_v55 = vadd.f32 1.0, %v2156_v48  ;;  %v2063_v48 = vld [vmem:[%s3686_s0 + $0xa8] sm:$0xff] }
 0x4e1   :  { %2161 = vrcp.f32 %v1244_v62 }
 0x4e2   :  { %2163 = vrcp.f32 %v1251_v55  ;;  %v2062_v55 = vld [vmem:[%s3686_s0 + $0xa0] sm:$0xff] }
 0x4ec   :  { %v2158_v33 = vpop.eup %2157 }
 0x4ed   :  { %v2160_v35 = vpop.eup %2159 }
 0x4ee   :  { %v2162_v39 = vpop.eup %2161  ;;  %v1255_v9 = vmul.f32 %v2160_v35, %v2158_v33 }
 0x4ef   :  { %v1254_v52 = vmul.f32 %v2162_v39, %v3332_v31  ;;  %v2164_v43 = vpop.eup %2163 }
 0x4f1   :  { %v1256_v63 = vadd.f32 %v1255_v9, %v1254_v52 }
 0x4f3   :  { %2165 = vtanh.f32 %v1256_v63  ;;  %v3428_v44 = vsel %vm1261_vm4, %v1256_v63, %v3332_v31  ;;  %v3854_v31 = vld [vmem:[#allocation17_spill] sm:$0xff] }
 0x500   :  { %v2166_v60 = vpop.eup %2165 }
 0x501   :  { %v1258_v50 = vmul.f32 %v2166_v60, %v2164_v43  ;;  %v2065_v43 = vld [vmem:[%s3686_s0 + $0xb8] sm:$0xff] }
 0x503   :  { %v3431_v37 = vsel %vm1261_vm4, %v1258_v50, %v3335_v38  ;;  %v1264_v45 = vsel %vm1261_vm4, %v1258_v50, 0.0  ;;  %v3855_v38 = vld [vmem:[#allocation10_spill] sm:$0xff] }
 0x504   :  { %2061 = vst [vmem:[%s3689_s5 + $0x20] sm:$0xff] %v1264_v45  ;;  %1401 = vmatmul.mubr.f32.vlgmr.msra.gmra.mxu0 %v3431_v37  ;;  %1472 = vmatmul.mubr.f32.vlgmr.msra.gmra.mxu1 %v3431_v37  ;;  %v2064_v45 = vld [vmem:[%s3686_s0 + $0xb0] sm:$0xff] }
 0x505   :  { %1584 = vmatpush1.msra.mxu0 %v3069_v58  ;;  %1655 = vmatpush1.msra.mxu1 %v3076_v59 }
 0x506   :  { %1585 = vmatprep.subr.mxu0 %v3081_v47  ;;  %1656 = vmatprep.subr.mxu1 %v3086_v49 }
 0x507   :  { %1586 = vmatpush1.msra.mxu0 %v3093_v51  ;;  %1657 = vmatpush1.msra.mxu1 %v3098_v53 }
 0x508   :  { %1587 = vmatprep.subr.mxu0 %v3103_v61  ;;  %1658 = vmatprep.subr.mxu1 %v3110_v3 }
 0x509   :  { %1588 = vmatpush1.msra.mxu0 %v3115_v8  ;;  %1659 = vmatpush1.msra.mxu1 %v3120_v12 }
 0x50a   :  { %1589 = vmatprep.subr.mxu0 %v3127_v17  ;;  %1660 = vmatprep.subr.mxu1 %v3132_v22 }
 0x50b   :  { %1590 = vmatpush1.msra.mxu0 %v2882_v1  ;;  %1661 = vmatpush1.msra.mxu1 %v3139_v26  ;;  %v3837_v1 = vld [vmem:[#allocation11_spill] sm:$0xff] }
 0x50c   :  { %1591 = vmatprep.subr.mxu0 %v2887_v2  ;;  %1662 = vmatprep.subr.mxu1 %v3146_v30  ;;  %v3838_v2 = vld [vmem:[#allocation12_spill] sm:$0xff] }
 0x50d   :  { %1592 = vmatpush1.msra.mxu0 %v2892_v4  ;;  %1663 = vmatpush1.msra.mxu1 %v3153_v34  ;;  %v3839_v4 = vld [vmem:[#allocation6_spill] sm:$0xff] }
 0x50e   :  { %1593 = vmatprep.subr.mxu0 %v2898_v5  ;;  %1664 = vmatprep.subr.mxu1 %v3160_v40  ;;  %v3840_v5 = vld [vmem:[#allocation19_spill] sm:$0xff] }
 0x50f   :  { %1594 = vmatpush1.msra.mxu0 %v2904_v6  ;;  %1665 = vmatpush1.msra.mxu1 %v3167_v57  ;;  %v3841_v6 = vld [vmem:[#allocation13_spill] sm:$0xff] }
 0x510   :  { %1595 = vmatprep.subr.mxu0 %v2910_v7  ;;  %1666 = vmatprep.subr.mxu1 %v3174_v54  ;;  %v3842_v7 = vld [vmem:[#allocation14_spill] sm:$0xff] }
 0x511   :  { %1596 = vmatpush1.msra.mxu0 %v2916_v11  ;;  %1667 = vmatpush1.msra.mxu1 %v3181_v56  ;;  %v3843_v11 = vld [vmem:[#allocation7_spill] sm:$0xff] }
 0x512   :  { %1597 = vmatprep.subr.mxu0 %v2922_v13  ;;  %1668 = vmatprep.subr.mxu1 %v3188_v46  ;;  %v3844_v13 = vld [vmem:[#allocation20_spill] sm:$0xff] }
 0x513   :  { %1598 = vmatpush1.msra.mxu0 %v2928_v14  ;;  %1669 = vmatpush1.msra.mxu1 %v3195_v10  ;;  %v3845_v14 = vld [vmem:[#allocation15_spill] sm:$0xff] }
 0x514   :  { %1599 = vmatprep.subr.mxu0 %v2934_v16  ;;  %1670 = vmatprep.subr.mxu1 %v3202_v15  ;;  %v3846_v16 = vld [vmem:[#allocation4_spill] sm:$0xff] }
 0x515   :  { %1600 = vmatpush1.msra.mxu0 %v2940_v18  ;;  %1671 = vmatpush1.msra.mxu1 %v3209_v20  ;;  %v3847_v18 = vld [vmem:[#allocation8_spill] sm:$0xff] }
 0x516   :  { %1601 = vmatprep.subr.mxu0 %v2946_v19  ;;  %1672 = vmatprep.subr.mxu1 %v3216_v24  ;;  %v3848_v19 = vld [vmem:[#allocation5_spill] sm:$0xff] }
 0x517   :  { %1602 = vmatpush1.msra.mxu0 %v2952_v21  ;;  %1673 = vmatpush1.msra.mxu1 %v3223_v28  ;;  %v3849_v21 = vld [vmem:[#allocation16_spill] sm:$0xff] }
 0x518   :  { %1603 = vmatprep.subr.mxu0 %v2958_v23  ;;  %1674 = vmatprep.subr.mxu1 %v3230_v32  ;;  %v3850_v23 = vld [vmem:[#allocation21_spill] sm:$0xff] }
 0x519   :  { %1604 = vmatpush1.msra.mxu0 %v2964_v25  ;;  %1675 = vmatpush1.msra.mxu1 %v3237_v36  ;;  %v3851_v25 = vld [vmem:[#allocation9_spill] sm:$0xff] }
 0x51a   :  { %1605 = vmatprep.subr.mxu0 %v2970_v27  ;;  %1676 = vmatprep.subr.mxu1 %v3244_v42  ;;  %v3852_v27 = vmov 0.0  }
 0x51b   :  { %1606 = vmatpush1.msra.mxu0 %v2976_v29  ;;  %1677 = vmatpush1.msra.mxu1 %v3817_v0  ;;  %v3853_v29 = vld [vmem:[#allocation22_spill] sm:$0xff] }
 0x51c   :  { %1607 = vmatprep.subr.mxu0 %v3837_v1  ;;  %1678 = vmatprep.subr.mxu1 %v3838_v2 }
 0x51d   :  { %1608 = vmatpush1.msra.mxu0 %v3839_v4  ;;  %1679 = vmatpush1.msra.mxu1 %v3840_v5 }
 0x51e   :  { %1609 = vmatprep.subr.mxu0 %v3841_v6  ;;  %1680 = vmatprep.subr.mxu1 %v3842_v7 }
 0x51f   :  { %1610 = vmatpush1.msra.mxu0 %v3843_v11  ;;  %1681 = vmatpush1.msra.mxu1 %v3844_v13 }
 0x520   :  { %1611 = vmatprep.subr.mxu0 %v3845_v14  ;;  %1682 = vmatprep.subr.mxu1 %v3846_v16 }
 0x521   :  { %1612 = vmatpush1.msra.mxu0 %v3847_v18  ;;  %1683 = vmatpush1.msra.mxu1 %v3848_v19 }
 0x522   :  { %1613 = vmatprep.subr.mxu0 %v3849_v21  ;;  %1684 = vmatprep.subr.mxu1 %v3850_v23 }
 0x523   :  { %1614 = vmatpush1.msra.mxu0 %v3851_v25  ;;  %1647 = vmatprep.mubr.f32.mxu0 %v3852_v27 }
 0x524   :  { %1685 = vmatpush1.msra.mxu1 %v3853_v29  ;;  %1718 = vmatprep.mubr.f32.mxu1 %v3852_v27 }
 0x525   :  { %1830 = vmatprep.subr.mxu0 %v3854_v31  ;;  %1901 = vmatprep.subr.mxu1 %v3855_v38 }
 0x5c4   :  { %v1402_v62 = vpop.f32.mrf.mxu0  ;;  %v1473_v9 = vpop.f32.mrf.mxu1 }
 0x5c5   :  { %v1478_v33 = vadd.f32 %v2062_v55, %v1402_v62  ;;  %v1480_v6 = vadd.f32 %v2064_v45, %v1473_v9 }
 0x5c6   :  { %v1404_v35 = vpop.f32.mrf.mxu0  ;;  %v1475_v60 = vpop.f32.mrf.mxu1 }
 0x5c7   :  { %v2066_v39 = vmul.f32 -1.442695, %v1478_v33  ;;  %v1479_v52 = vadd.f32 %v2063_v48, %v1404_v35  ;;  %v1481_v50 = vadd.f32 %v2065_v43, %v1475_v60 }
 0x5c9   :  { %2167 = vpow2.f32 %v2066_v39  ;;  %v2067_v63 = vmul.f32 -1.442695, %v1479_v52  ;;  %v2068_v1 = vmul.f32 -1.442695, %v1481_v50 }
 0x5cb   :  { %2169 = vpow2.f32 %v2067_v63 }
 0x5cc   :  { %2171 = vpow2.f32 %v2068_v1 }
 0x5d6   :  { %v2168_v4 = vpop.eup %2167 }
 0x5d7   :  { %v1485_v11 = vadd.f32 1.0, %v2168_v4 }
 0x5d8   :  { %v2170_v14 = vpop.eup %2169 }
 0x5d9   :  { %2173 = vrcp.f32 %v1485_v11  ;;  %v1491_v18 = vadd.f32 1.0, %v2170_v14  ;;  %v2172_v21 = vpop.eup %2171 }
 0x5da   :  { %2175 = vtanh.f32 %v1480_v6  ;;  %v1498_v55 = vadd.f32 1.0, %v2172_v21 }
 0x5db   :  { %2177 = vrcp.f32 %v1491_v18 }
 0x5dc   :  { %2179 = vrcp.f32 %v1498_v55 }
 0x5e6   :  { %v2174_v25 = vpop.eup %2173 }
 0x5e7   :  { %v2176_v31 = vpop.eup %2175 }
 0x5e8   :  { %v2178_v38 = vpop.eup %2177  ;;  %v1502_v48 = vmul.f32 %v2176_v31, %v2174_v25 }
 0x5e9   :  { %v1501_v62 = vmul.f32 %v2178_v38, %v3428_v44  ;;  %v2180_v39 = vpop.eup %2179 }
 0x5eb   :  { %v1503_v33 = vadd.f32 %v1502_v48, %v1501_v62 }
 0x5ed   :  { %2181 = vtanh.f32 %v1503_v33  ;;  %v3519_v35 = vsel %vm1508_vm5, %v1503_v33, %v3428_v44 }
 0x5fa   :  { %v2182_v52 = vpop.eup %2181 }
 0x5fb   :  { %v1505_v9 = vmul.f32 %v2182_v52, %v2180_v39  ;;  %v2078_v52 = vld [vmem:[%s3686_s0 + $0xe0] sm:$0xff] }
 0x5fd   :  { %v3522_v63 = vsel %vm1508_vm5, %v1505_v9, %v3431_v37  ;;  %v1511_v43 = vsel %vm1508_vm5, %v1505_v9, 0.0 }
 0x5fe   :  { %2069 = vst [vmem:[%s3689_s5 + $0x28] sm:$0xff] %v1511_v43  ;;  %1648 = vmatmul.mubr.f32.vlgmr.msra.gmra.mxu0 %v3522_v63  ;;  %1719 = vmatmul.mubr.f32.vlgmr.msra.gmra.mxu1 %v3522_v63 }
 0x5ff   :  { %1831 = vmatpush1.msra.mxu0 %v3069_v58  ;;  %1902 = vmatpush1.msra.mxu1 %v3076_v59  ;;  %v1814_v58 = vld [vmem:[%s3684_s4 + $0x180] sm:$0xff]  ;;  %v1811_v59 = vld [vmem:[%s3684_s4 + $0x168] sm:$0xff] }
 0x600   :  { %1832 = vmatprep.subr.mxu0 %v3081_v47  ;;  %1903 = vmatprep.subr.mxu1 %v3086_v49  ;;  %v1810_v47 = vld [vmem:[%s3684_s4 + $0x160] sm:$0xff]  ;;  %v1807_v49 = vld [vmem:[%s3684_s4 + $0x148] sm:$0xff] }
 0x601   :  { %1833 = vmatpush1.msra.mxu0 %v3093_v51  ;;  %1904 = vmatpush1.msra.mxu1 %v3098_v53  ;;  %v1806_v51 = vld [vmem:[%s3684_s4 + $0x140] sm:$0xff]  ;;  %v1803_v53 = vld [vmem:[%s3684_s4 + $0x128] sm:$0xff] }
 0x602   :  { %1834 = vmatprep.subr.mxu0 %v3103_v61  ;;  %1905 = vmatprep.subr.mxu1 %v3110_v3  ;;  %v1802_v61 = vld [vmem:[%s3684_s4 + $0x120] sm:$0xff]  ;;  %v1799_v3 = vld [vmem:[%s3684_s4 + $0x108] sm:$0xff] }
 0x603   :  { %1835 = vmatpush1.msra.mxu0 %v3115_v8  ;;  %1906 = vmatpush1.msra.mxu1 %v3120_v12  ;;  %v1798_v8 = vld [vmem:[%s3684_s4 + $0x100] sm:$0xff]  ;;  %v1795_v12 = vld [vmem:[%s3684_s4 + $0xe8] sm:$0xff] }
 0x604   :  { %1836 = vmatprep.subr.mxu0 %v3127_v17  ;;  %1907 = vmatprep.subr.mxu1 %v3132_v22  ;;  %v1794_v17 = vld [vmem:[%s3684_s4 + $0xe0] sm:$0xff]  ;;  %v1791_v22 = vld [vmem:[%s3684_s4 + $0xc8] sm:$0xff] }
 0x605   :  { %1908 = vmatpush1.msra.mxu1 %v3139_v26  ;;  %1894 = vmatprep.mubr.f32.mxu0 %v3852_v27  ;;  %v1790_v26 = vld [vmem:[%s3684_s4 + $0xc0] sm:$0xff] }
 0x606   :  { %1909 = vmatprep.subr.mxu1 %v3146_v30  ;;  %1965 = vmatprep.mubr.f32.mxu1 %v3852_v27  ;;  %v1787_v30 = vld [vmem:[%s3684_s4 + $0xa8] sm:$0xff] }
 0x607   :  { %1910 = vmatpush1.msra.mxu1 %v3153_v34  ;;  %1837 = vmatpush1.msra.mxu0 %v1814_v58  ;;  %v1786_v34 = vld [vmem:[%s3684_s4 + $0xa0] sm:$0xff] }
 0x608   :  { %1911 = vmatprep.subr.mxu1 %v3160_v40  ;;  %1838 = vmatprep.subr.mxu0 %v1811_v59  ;;  %v1783_v40 = vld [vmem:[%s3684_s4 + $0x88] sm:$0xff] }
 0x609   :  { %1912 = vmatpush1.msra.mxu1 %v3167_v57  ;;  %1839 = vmatpush1.msra.mxu0 %v1810_v47  ;;  %v1782_v57 = vld [vmem:[%s3684_s4 + $0x80] sm:$0xff] }
 0x60a   :  { %1913 = vmatprep.subr.mxu1 %v3174_v54  ;;  %1840 = vmatprep.subr.mxu0 %v1807_v49  ;;  %v1779_v54 = vld [vmem:[%s3684_s4 + $0x68] sm:$0xff] }
 0x60b   :  { %1914 = vmatpush1.msra.mxu1 %v3181_v56  ;;  %1841 = vmatpush1.msra.mxu0 %v1806_v51  ;;  %v1778_v56 = vld [vmem:[%s3684_s4 + $0x60] sm:$0xff]  ;;  %v2081_v51 = vld [vmem:[%s3686_s0 + $0xf8] sm:$0xff] }
 0x60c   :  { %1915 = vmatprep.subr.mxu1 %v3188_v46  ;;  %1842 = vmatprep.subr.mxu0 %v1803_v53  ;;  %v1775_v46 = vld [vmem:[%s3684_s4 + $0x48] sm:$0xff] }
 0x60d   :  { %1916 = vmatpush1.msra.mxu1 %v3195_v10  ;;  %1843 = vmatpush1.msra.mxu0 %v1802_v61  ;;  %v1774_v10 = vld [vmem:[%s3684_s4 + $0x40] sm:$0xff] }
 0x60e   :  { %1917 = vmatprep.subr.mxu1 %v3202_v15  ;;  %1844 = vmatprep.subr.mxu0 %v1799_v3  ;;  %v1771_v15 = vld [vmem:[%s3684_s4 + $0x28] sm:$0xff]  ;;  %v2080_v3 = vld [vmem:[%s3686_s0 + $0xf0] sm:$0xff] }
 0x60f   :  { %1918 = vmatpush1.msra.mxu1 %v3209_v20  ;;  %1845 = vmatpush1.msra.mxu0 %v1798_v8  ;;  %v1770_v20 = vld [vmem:[%s3684_s4 + $0x20] sm:$0xff] }
 0x610   :  { %1919 = vmatprep.subr.mxu1 %v3216_v24  ;;  %1846 = vmatprep.subr.mxu0 %v1795_v12  ;;  %v1767_v24 = vld [vmem:[%s3684_s4 + $0x8] sm:$0xff] }
 0x611   :  { %1920 = vmatpush1.msra.mxu1 %v3223_v28  ;;  %1847 = vmatpush1.msra.mxu0 %v1794_v17  ;;  %v1766_v28 = vld [vmem:[%s3684_s4] sm:$0xff] }
 0x612   :  { %1921 = vmatprep.subr.mxu1 %v3230_v32  ;;  %1848 = vmatprep.subr.mxu0 %v1791_v22  ;;  %v2070_v32 = vld [vmem:[%s3686_s0 + $0xc0] sm:$0xff] }
 0x613   :  { %1922 = vmatpush1.msra.mxu1 %v3237_v36  ;;  %1849 = vmatpush1.msra.mxu0 %v1790_v26 }
 0x614   :  { %1923 = vmatprep.subr.mxu1 %v3244_v42  ;;  %1850 = vmatprep.subr.mxu0 %v1787_v30  ;;  %v2071_v42 = vld [vmem:[%s3686_s0 + $0xc8] sm:$0xff] }
 0x615   :  { %1924 = vmatpush1.msra.mxu1 %v3817_v0  ;;  %1851 = vmatpush1.msra.mxu0 %v1786_v34 }
 0x616   :  { %1925 = vmatprep.subr.mxu1 %v3838_v2  ;;  %1852 = vmatprep.subr.mxu0 %v1783_v40 }
 0x617   :  { %1926 = vmatpush1.msra.mxu1 %v3840_v5  ;;  %1853 = vmatpush1.msra.mxu0 %v1782_v57 }
 0x618   :  { %1927 = vmatprep.subr.mxu1 %v3842_v7  ;;  %1854 = vmatprep.subr.mxu0 %v1779_v54 }
 0x619   :  { %1928 = vmatpush1.msra.mxu1 %v3844_v13  ;;  %1855 = vmatpush1.msra.mxu0 %v1778_v56  ;;  %v2073_v13 = vld [vmem:[%s3686_s0 + $0xd8] sm:$0xff] }
 0x61a   :  { %1929 = vmatprep.subr.mxu1 %v3846_v16  ;;  %1856 = vmatprep.subr.mxu0 %v1775_v46 }
 0x61b   :  { %1930 = vmatpush1.msra.mxu1 %v3848_v19  ;;  %1857 = vmatpush1.msra.mxu0 %v1774_v10 }
 0x61c   :  { %1931 = vmatprep.subr.mxu1 %v3850_v23  ;;  %1858 = vmatprep.subr.mxu0 %v1771_v15  ;;  %v2072_v23 = vld [vmem:[%s3686_s0 + $0xd0] sm:$0xff] }
 0x61d   :  { %1932 = vmatpush1.msra.mxu1 %v3853_v29  ;;  %1859 = vmatpush1.msra.mxu0 %v1770_v20 }
 0x61e   :  { %1860 = vmatprep.subr.mxu0 %v1767_v24 }
 0x61f   :  { %1861 = vmatpush1.msra.mxu0 %v1766_v28 }
 0x6be   :  { %v1649_v36 = vpop.f32.mrf.mxu0  ;;  %v1720_v5 = vpop.f32.mrf.mxu1 }
 0x6bf   :  { %v1725_v0 = vadd.f32 %v2070_v32, %v1649_v36  ;;  %v1727_v60 = vadd.f32 %v2072_v23, %v1720_v5 }
 0x6c0   :  { %v1651_v44 = vpop.f32.mrf.mxu0  ;;  %v1722_v16 = vpop.f32.mrf.mxu1 }
 0x6c1   :  { %v2074_v37 = vmul.f32 -1.442695, %v1725_v0  ;;  %v1726_v2 = vadd.f32 %v2071_v42, %v1651_v44  ;;  %v1728_v19 = vadd.f32 %v2073_v13, %v1722_v16 }
 0x6c3   :  { %2183 = vpow2.f32 %v2074_v37  ;;  %v2075_v7 = vmul.f32 -1.442695, %v1726_v2  ;;  %v2076_v27 = vmul.f32 -1.442695, %v1728_v19 }
 0x6c5   :  { %2185 = vpow2.f32 %v2075_v7 }
 0x6c6   :  { %2187 = vpow2.f32 %v2076_v27 }
 0x6d0   :  { %v2184_v29 = vpop.eup %2183 }
 0x6d1   :  { %v1732_v50 = vadd.f32 1.0, %v2184_v29 }
 0x6d2   :  { %v2186_v45 = vpop.eup %2185 }
 0x6d3   :  { %2189 = vrcp.f32 %v1732_v50  ;;  %v1738_v1 = vadd.f32 1.0, %v2186_v45  ;;  %v2188_v4 = vpop.eup %2187 }
 0x6d4   :  { %2191 = vtanh.f32 %v1727_v60  ;;  %v1745_v18 = vadd.f32 1.0, %v2188_v4 }
 0x6d5   :  { %2193 = vrcp.f32 %v1738_v1 }
 0x6d6   :  { %2195 = vrcp.f32 %v1745_v18 }
 0x6e0   :  { %v2190_v6 = vpop.eup %2189 }
 0x6e1   :  { %v2192_v11 = vpop.eup %2191 }
 0x6e2   :  { %v2194_v14 = vpop.eup %2193  ;;  %v1749_v25 = vmul.f32 %v2192_v11, %v2190_v6 }
 0x6e3   :  { %v1748_v21 = vmul.f32 %v2194_v14, %v3519_v35  ;;  %v2196_v55 = vpop.eup %2195 }
 0x6e5   :  { %v1750_v31 = vadd.f32 %v1749_v25, %v1748_v21 }
 0x6e7   :  { %2197 = vtanh.f32 %v1750_v31  ;;  %v1757_v38 = vsel %vm1755_vm6, %v1750_v31, %v3519_v35  ;;  %v2079_v35 = vld [vmem:[%s3686_s0 + $0xe8] sm:$0xff] }
 0x6f4   :  { %v2198_v62 = vpop.eup %2197 }
 0x6f5   :  { %v1752_v48 = vmul.f32 %v2198_v62, %v2196_v55 }
 0x6f7   :  { %v1756_v33 = vsel %vm1755_vm6, %v1752_v48, %v3522_v63  ;;  %v1758_v39 = vsel %vm1755_vm6, %v1752_v48, 0.0 }
 0x6f8   :  { %2077 = vst [vmem:[%s3689_s5 + $0x30] sm:$0xff] %v1758_v39  ;;  %1895 = vmatmul.mubr.f32.vlgmr.msra.gmra.mxu0 %v1756_v33  ;;  %1966 = vmatmul.mubr.f32.vlgmr.msra.gmra.mxu1 %v1756_v33 }
 0x7b8   :  { %v1896_v9 = vpop.f32.mrf.mxu0  ;;  %v1967_v47 = vpop.f32.mrf.mxu1 }
 0x7b9   :  { %v1972_v43 = vadd.f32 %v2078_v52, %v1896_v9  ;;  %v1974_v17 = vadd.f32 %v2080_v3, %v1967_v47 }
 0x7ba   :  { %v1898_v58 = vpop.f32.mrf.mxu0  ;;  %v1969_v53 = vpop.f32.mrf.mxu1 }
 0x7bb   :  { %v2082_v59 = vmul.f32 -1.442695, %v1972_v43  ;;  %v1973_v63 = vadd.f32 %v2079_v35, %v1898_v58  ;;  %v1975_v61 = vadd.f32 %v2081_v51, %v1969_v53 }
 0x7bd   :  { %2199 = vpow2.f32 %v2082_v59  ;;  %v2083_v49 = vmul.f32 -1.442695, %v1973_v63  ;;  %v2084_v8 = vmul.f32 -1.442695, %v1975_v61 }
 0x7bf   :  { %2201 = vpow2.f32 %v2083_v49 }
 0x7c0   :  { %2203 = vpow2.f32 %v2084_v8 }
 0x7ca   :  { %v2200_v12 = vpop.eup %2199 }
 0x7cb   :  { %v1979_v22 = vadd.f32 1.0, %v2200_v12 }
 0x7cc   :  { %v2202_v26 = vpop.eup %2201 }
 0x7cd   :  { %2205 = vrcp.f32 %v1979_v22  ;;  %v1985_v30 = vadd.f32 1.0, %v2202_v26  ;;  %v2204_v34 = vpop.eup %2203 }
 0x7ce   :  { %2207 = vtanh.f32 %v1974_v17  ;;  %v1992_v56 = vadd.f32 1.0, %v2204_v34 }
 0x7cf   :  { %2209 = vrcp.f32 %v1985_v30 }
 0x7d0   :  { %2211 = vrcp.f32 %v1992_v56 }
 0x7da   :  { %v2206_v40 = vpop.eup %2205 }
 0x7db   :  { %v2208_v57 = vpop.eup %2207 }
 0x7dc   :  { %v2210_v54 = vpop.eup %2209  ;;  %v1996_v46 = vmul.f32 %v2208_v57, %v2206_v40 }
 0x7dd   :  { %v1995_v10 = vmul.f32 %v2210_v54, %v1757_v38  ;;  %v2212_v24 = vpop.eup %2211 }
 0x7df   :  { %v1997_v15 = vadd.f32 %v1996_v46, %v1995_v10 }
 0x7e1   :  { %2213 = vtanh.f32 %v1997_v15  ;;  %v2004_v20 = vsel %vm2002_vm7, %v1997_v15, %v1757_v38 }
 0x7e2   :  { %2014 = vst [vmem:[%s3690_s7] sm:$0xff] %v2004_v20 }
 0x7ee   :  { %v2214_v28 = vpop.eup %2213 }
 0x7ef   :  { %v1999_v32 = vmul.f32 %v2214_v28, %v2212_v24 }
 0x7f1   :  { %v2003_v36 = vsel %vm2002_vm7, %v1999_v32, %v1756_v33  ;;  %v2005_v42 = vsel %vm2002_vm7, %v1999_v32, 0.0 }
 0x7f2   :  { %2085 = vst [vmem:[%s3689_s5 + $0x38] sm:$0xff] %v2005_v42  ;;  %2013 = vst [vmem:[%s3691_s6] sm:$0xff] %v2003_v36 }

</bundles_post_ra>
